<compile_context>
chip_gen: v6e
topology: v6e:2x2x1
jax: 0.10.0
libtpu: 0.0.40
codegen_flags: <defaults>
</compile_context>

<pallas_src>
import functools

import jax
import jax.numpy as jnp
from jax.experimental import pallas as pl
from jax.experimental.pallas import tpu as pltpu


# ----------------------------------------------------------------------------
# Generation-aware VMEM / tiling choices
# ----------------------------------------------------------------------------
def _vmem_limit_bytes():
    """Scoped-VMEM request with headroom below the physical per-core capacity."""
    try:
        cap = int(pltpu.get_tpu_info().vmem_capacity_bytes)
    except Exception:
        cap = 64 * 1024 * 1024  # conservative fallback (v7x per-TensorCore size)
    # ~75% of physical, never above 100 MiB: v7x -> 48 MiB, v5e/v6e -> 96 MiB.
    return max(32 * 1024 * 1024, min((cap * 3) // 4, 100 * 1024 * 1024))


def _pick_proj_tile(s):
    """Sequence tile for the QKV projection kernel."""
    if s <= 512:
        return s
    for t in (512, 256, 128):
        if s % t == 0:
            return t
    return s


def _pick_seq_tile(s, hid_dim, pf_dim, n_heads, vmem_bytes):
    """Query tile for the attention/FFN kernel, sized against the VMEM budget."""
    if s <= 256:
        return s
    budget = int(vmem_bytes * 0.6)
    w_bytes = 2 * (hid_dim * hid_dim + 2 * hid_dim * pf_dim) * 2     # bf16, dbl-buffered
    kv_bytes = 2 * 2 * s * hid_dim * 2                               # K + V blocks, bf16
    for t in (512, 256, 128):
        if s % t:
            continue
        blocks = 2 * (t * hid_dim * 2 + 2 * t * hid_dim * 4)          # q + x/out blocks
        live = 2 * n_heads * t * s * 4 + t * pf_dim * 4 + 2 * t * hid_dim * 4
        if w_bytes + kv_bytes + blocks + live <= budget:
            return t
    return 128 if s % 128 == 0 else s


# ----------------------------------------------------------------------------
# Kernel 1: fused Q/K/V projection (one wide bf16 MXU matmul per seq tile)
#   qkv = x @ Wqkv + bqkv ;   q|k|v written as bf16 (B, S, H) arrays.
#   The Q section of Wqkv is pre-scaled by 1/sqrt(head_dim) at init.
# ----------------------------------------------------------------------------
def _qkv_proj_kernel(x_ref, wqkv_ref, bqkv_ref, q_ref, k_ref, v_ref):
    H = x_ref.shape[2]
    xb = x_ref[0].astype(jnp.bfloat16)                                   # (t, H)
    qkv = jnp.dot(xb, wqkv_ref[...],
                  preferred_element_type=jnp.float32) + bqkv_ref[...]    # (t, 3H)
    q_ref[0] = qkv[:, :H].astype(jnp.bfloat16)
    k_ref[0] = qkv[:, H:2 * H].astype(jnp.bfloat16)
    v_ref[0] = qkv[:, 2 * H:].astype(jnp.bfloat16)


def qkv_projection(x, lp, tkv, vmem_bytes):
    B, S, H = x.shape
    nk = S // tkv
    return pl.pallas_call(
        _qkv_proj_kernel,
        out_shape=(jax.ShapeDtypeStruct((B, S, H), jnp.bfloat16),
                   jax.ShapeDtypeStruct((B, S, H), jnp.bfloat16),
                   jax.ShapeDtypeStruct((B, S, H), jnp.bfloat16)),
        grid=(B, nk),
        in_specs=[
            pl.BlockSpec((1, tkv, H), lambda b, i: (b, i, 0)),
            pl.BlockSpec(lp["wqkv"].shape, lambda b, i: (0, 0)),
            pl.BlockSpec(lp["bqkv"].shape, lambda b, i: (0, 0)),
        ],
        out_specs=(pl.BlockSpec((1, tkv, H), lambda b, i: (b, i, 0)),
                   pl.BlockSpec((1, tkv, H), lambda b, i: (b, i, 0)),
                   pl.BlockSpec((1, tkv, H), lambda b, i: (b, i, 0))),
        compiler_params=pltpu.CompilerParams(
            dimension_semantics=("parallel", "parallel"),
            vmem_limit_bytes=vmem_bytes),
    )(x, lp["wqkv"], lp["bqkv"])


# ----------------------------------------------------------------------------
# Kernel 2: attention (with pre-projected per-head Q/K/V) + residual/LayerNorm
#           + positionwise FFN + residual/LayerNorm, per (batch, query-tile).
# ----------------------------------------------------------------------------
def _layer_norm(x, g, b, eps=1e-5):
    mu = jnp.mean(x, axis=-1, keepdims=True)
    var = jnp.mean((x - mu) ** 2, axis=-1, keepdims=True)
    return (x - mu) * jax.lax.rsqrt(var + eps) * g + b


def _encoder_layer_kernel(
    x_ref, mask_ref, q_ref, k_ref, v_ref,
    wo_ref, bo_ref,
    g1_ref, be1_ref,
    w1_ref, b1_ref, w2_ref, b2_ref,
    g2_ref, be2_ref,
    out_ref,
):
    n_heads = q_ref.shape[1]

    x = x_ref[0]                  # (tq, H) f32  — residual path (query tile only)
    qh = q_ref[0]                 # (h, tq, hd) bf16, already scaled by 1/sqrt(hd)
    kh = k_ref[0]                 # (h, S,  hd) bf16
    vh = v_ref[0]                 # (h, S,  hd) bf16

    # ----- attention scores, batch-leading head einsum (bf16 MXU, f32 acc) -----
    scores = jnp.einsum("hqd,hkd->hqk", qh, kh,
                        preferred_element_type=jnp.float32)              # (h, tq, S)
    bias = jnp.where(mask_ref[0] != 0, 0.0, -1e10).astype(jnp.float32)   # (1, S)
    scores = scores + bias[None, :, :]

    m = jnp.max(scores, axis=-1, keepdims=True)
    p = jnp.exp(scores - m)
    attn = p * pl.reciprocal(jnp.sum(p, axis=-1, keepdims=True), approx=True)

    ctx = jnp.einsum("hqk,hkd->hqd", attn.astype(jnp.bfloat16), vh,
                     preferred_element_type=jnp.float32)                 # (h, tq, hd)

    # merge heads (head-major columns) and do ONE (tq,H)x(H,H) output matmul
    ctx2 = jnp.concatenate([ctx[i] for i in range(n_heads)],
                           axis=-1).astype(jnp.bfloat16)                 # (tq, H)
    attn_out = jnp.dot(ctx2, wo_ref[...],
                       preferred_element_type=jnp.float32) + bo_ref[...]

    src = _layer_norm(x + attn_out, g1_ref[...], be1_ref[...])           # (tq, H)

    # ----- positionwise feedforward (bf16 matmuls, f32 accumulation) -----
    h1 = jnp.maximum(
        jnp.dot(src.astype(jnp.bfloat16), w1_ref[...],
                preferred_element_type=jnp.float32) + b1_ref[...], 0.0)  # (tq, PF)
    ff = jnp.dot(h1.astype(jnp.bfloat16), w2_ref[...],
                 preferred_element_type=jnp.float32) + b2_ref[...]       # (tq, H)

    out_ref[0] = _layer_norm(src + ff, g2_ref[...], be2_ref[...])


def encoder_layer(x, mask, qh, kh, vh, lp, tq, vmem_bytes):
    B, S, H = x.shape
    n_heads, hd = qh.shape[1], qh.shape[3]
    nq = S // tq

    weights = [lp["wo"], lp["bo"], lp["g1"], lp["be1"],
               lp["w1"], lp["b1"], lp["w2"], lp["b2"], lp["g2"], lp["be2"]]

    def wspec(arr):
        return pl.BlockSpec(arr.shape, lambda b, q: (0, 0))

    return pl.pallas_call(
        _encoder_layer_kernel,
        out_shape=jax.ShapeDtypeStruct((B, S, H), jnp.float32),
        grid=(B, nq),
        in_specs=[
            pl.BlockSpec((1, tq, H), lambda b, q: (b, q, 0)),             # x query tile
            pl.BlockSpec((1, 1, S), lambda b, q: (b, 0, 0)),              # key mask
            pl.BlockSpec((1, n_heads, tq, hd), lambda b, q: (b, 0, q, 0)),  # Q tile
            pl.BlockSpec((1, n_heads, S, hd), lambda b, q: (b, 0, 0, 0)),   # K (full S)
            pl.BlockSpec((1, n_heads, S, hd), lambda b, q: (b, 0, 0, 0)),   # V (full S)
        ] + [wspec(w) for w in weights],
        out_specs=pl.BlockSpec((1, tq, H), lambda b, q: (b, q, 0)),
        compiler_params=pltpu.CompilerParams(
            dimension_semantics=("parallel", "parallel"),
            vmem_limit_bytes=vmem_bytes),
    )(x, mask, qh, kh, vh, *weights)


# ----------------------------------------------------------------------------
# Full Encoder forward (embedding gathers + head split in JAX glue,
# hot matmul/attention paths in Pallas)
# ----------------------------------------------------------------------------
def encoder_forward(src, src_mask, params, n_heads):
    B, S = src.shape
    H = params["token_embedding"].shape[1]
    hd = H // n_heads
    PF = params["layers"][0]["w1"].shape[1]

    tok = jnp.take(params["token_embedding"], src, axis=0)               # (B, S, H)
    pos = jnp.take(params["pos_embedding"],
                   jnp.arange(S, dtype=jnp.int32), axis=0)               # (S, H)
    # scale+add left to XLA so it fuses with the embedding gather (no extra
    # HBM round trip through a standalone elementwise kernel).
    x = (tok * (float(H) ** 0.5) + pos[None, :, :]).astype(jnp.float32)

    vmem = _vmem_limit_bytes()
    tkv = _pick_proj_tile(S)
    tq = _pick_seq_tile(S, H, PF, n_heads, vmem)

    def split_heads(t):  # (B, S, H) -> (B, h, S, hd); cheap XLA transpose, outside Pallas
        return t.reshape(B, S, n_heads, hd).transpose(0, 2, 1, 3)

    for lp in params["layers"]:
        q2, k2, v2 = qkv_projection(x, lp, tkv, vmem)                    # Pallas
        x = encoder_layer(x, src_mask,
                          split_heads(q2), split_heads(k2), split_heads(v2),
                          lp, tq, vmem)                                  # Pallas
    return x


# ----------------------------------------------------------------------------
# Deterministic parameter construction (bf16 matmul weights; Q weights
# pre-scaled by 1/sqrt(head_dim); Q/K/V fused along the output columns)
# ----------------------------------------------------------------------------
def init_params(key, vocab_size, hid_dim, n_layers, n_heads, pf_dim):
    hd = hid_dim // n_heads
    inv_scale = 1.0 / (float(hd) ** 0.5)
    keys = jax.random.split(key, 2 + 6 * n_layers)
    ki = iter(keys)

    def dense(k, shape):
        return jax.random.normal(k, shape, dtype=jnp.float32) * 0.02

    params = {
        "token_embedding": dense(next(ki), (vocab_size, hid_dim)),
        "pos_embedding": dense(next(ki), (200, hid_dim)),
        "layers": [],
    }
    for _ in range(n_layers):
        wq = dense(next(ki), (hid_dim, hid_dim))
        wk = dense(next(ki), (hid_dim, hid_dim))
        wv = dense(next(ki), (hid_dim, hid_dim))
        wo = dense(next(ki), (hid_dim, hid_dim))
        w1 = dense(next(ki), (hid_dim, pf_dim))
        w2 = dense(next(ki), (pf_dim, hid_dim))

        wqkv = jnp.concatenate([wq * inv_scale, wk, wv], axis=1)         # (H, 3H)

        lp = {
            "wqkv": wqkv.astype(jnp.bfloat16),
            "bqkv": jnp.zeros((1, 3 * hid_dim), jnp.float32),
            "wo":   wo.astype(jnp.bfloat16),
            "bo":   jnp.zeros((1, hid_dim), jnp.float32),
            "g1":   jnp.ones((1, hid_dim), jnp.float32),
            "be1":  jnp.zeros((1, hid_dim), jnp.float32),
            "w1":   w1.astype(jnp.bfloat16),
            "b1":   jnp.zeros((1, pf_dim), jnp.float32),
            "w2":   w2.astype(jnp.bfloat16),
            "b2":   jnp.zeros((1, hid_dim), jnp.float32),
            "g2":   jnp.ones((1, hid_dim), jnp.float32),
            "be2":  jnp.zeros((1, hid_dim), jnp.float32),
        }
        params["layers"].append(lp)
    return params


if __name__ == "__main__":
    # small shapes consistent with the module's forward (lane-dense hidden dim)
    B, S = 2, 8
    vocab_size, hid_dim, n_layers, n_heads, pf_dim = 50, 128, 2, 4, 256

    key = jax.random.PRNGKey(0)
    kp, ks = jax.random.split(key)

    params = init_params(kp, vocab_size, hid_dim, n_layers, n_heads, pf_dim)

    src = jax.random.randint(ks, (B, S), 0, vocab_size, dtype=jnp.int32)
    # src_mask: [B, 1, S] — keep everything except the last two tokens of batch 1
    src_mask = jnp.ones((B, 1, S), dtype=jnp.int32)
    src_mask = src_mask.at[1, 0, S - 2:].set(0)

    fwd = jax.jit(functools.partial(encoder_forward, n_heads=n_heads))
    out = jax.block_until_ready(fwd(src, src_mask, params))

    assert out.shape == (B, S, hid_dim), out.shape
    assert bool(jnp.all(jnp.isfinite(out)))
    print("KERNEL_OK")
</pallas_src>

<mosaic_0001>
module attributes {stable_mosaic.version = 11 : i64} {
  func.func @_qkv_proj_kernel(%arg0: i32, %arg1: i32, %arg2: memref<1x8x128xf32, #tpu.memory_space<vmem>>, %arg3: memref<128x384xbf16, #tpu.memory_space<vmem>>, %arg4: memref<1x384xf32, #tpu.memory_space<vmem>>, %arg5: memref<1x8x128xbf16, #tpu.memory_space<vmem>>, %arg6: memref<1x8x128xbf16, #tpu.memory_space<vmem>>, %arg7: memref<1x8x128xbf16, #tpu.memory_space<vmem>>) attributes {dimension_semantics = [#tpu.dimension_semantics<parallel>, #tpu.dimension_semantics<parallel>], iteration_bounds = array<i64: 2, 1>, scalar_prefetch = 0 : i64, scratch_operands = 0 : i64, tpu.core_type = #tpu.core_type<tc>, window_params = [{transform_indices = @transform_0, window_bounds = array<i64: 1, 8, 128>}, {pipeline_mode = #tpu.pipeline_mode<synchronous>, transform_indices = @transform_1, window_bounds = array<i64: 128, 384>}, {pipeline_mode = #tpu.pipeline_mode<synchronous>, transform_indices = @transform_2, window_bounds = array<i64: 1, 384>}, {transform_indices = @transform_3, window_bounds = array<i64: 1, 8, 128>}, {transform_indices = @transform_4, window_bounds = array<i64: 1, 8, 128>}, {transform_indices = @transform_5, window_bounds = array<i64: 1, 8, 128>}]} {
    %c0 = arith.constant 0 : index
    %c0_0 = arith.constant 0 : index
    %c0_1 = arith.constant 0 : index
    %0 = vector.load %arg2[%c0, %c0_0, %c0_1] : memref<1x8x128xf32, #tpu.memory_space<vmem>>, vector<1x8x128xf32>
    %1 = vector.shape_cast %0 : vector<1x8x128xf32> to vector<8x128xf32>
    %2 = arith.truncf %1 : vector<8x128xf32> to vector<8x128xbf16>
    %c0_2 = arith.constant 0 : index
    %c0_3 = arith.constant 0 : index
    %3 = vector.load %arg3[%c0_2, %c0_3] : memref<128x384xbf16, #tpu.memory_space<vmem>>, vector<128x384xbf16>
    %cst = arith.constant dense<0.000000e+00> : vector<8x384xf32>
    %4 = tpu.matmul %2, %3, %cst {dimension_numbers = #tpu.dot_dimension_numbers<[1], [0], [0], [1], [0, 0, 1, 1], [], []>} : vector<8x128xbf16>, vector<128x384xbf16>, vector<8x384xf32> -> vector<8x384xf32>
    %c0_4 = arith.constant 0 : index
    %c0_5 = arith.constant 0 : index
    %5 = vector.load %arg4[%c0_4, %c0_5] : memref<1x384xf32, #tpu.memory_space<vmem>>, vector<1x384xf32>
    %6 = vector.broadcast %5 : vector<1x384xf32> to vector<8x384xf32>
    %7 = arith.addf %4, %6 : vector<8x384xf32>
    %8 = vector.extract_strided_slice %7 {offsets = [0, 0], sizes = [8, 128], strides = [1, 1]} : vector<8x384xf32> to vector<8x128xf32>
    %9 = arith.truncf %8 : vector<8x128xf32> to vector<8x128xbf16>
    %c0_6 = arith.constant 0 : index
    %c0_7 = arith.constant 0 : index
    %c0_8 = arith.constant 0 : index
    %10 = vector.load %arg5[%c0_6, %c0_7, %c0_8] : memref<1x8x128xbf16, #tpu.memory_space<vmem>>, vector<1x8x128xbf16>
    %11 = vector.shape_cast %10 : vector<1x8x128xbf16> to vector<8x128xbf16>
    %12 = vector.shape_cast %9 : vector<8x128xbf16> to vector<1x8x128xbf16>
    tpu.vector_store %arg5[%c0_6, %c0_7, %c0_8], %12 {strides = array<i32>} : memref<1x8x128xbf16, #tpu.memory_space<vmem>>, vector<1x8x128xbf16>,
    %13 = vector.extract_strided_slice %7 {offsets = [0, 128], sizes = [8, 128], strides = [1, 1]} : vector<8x384xf32> to vector<8x128xf32>
    %14 = arith.truncf %13 : vector<8x128xf32> to vector<8x128xbf16>
    %c0_9 = arith.constant 0 : index
    %c0_10 = arith.constant 0 : index
    %c0_11 = arith.constant 0 : index
    %15 = vector.load %arg6[%c0_9, %c0_10, %c0_11] : memref<1x8x128xbf16, #tpu.memory_space<vmem>>, vector<1x8x128xbf16>
    %16 = vector.shape_cast %15 : vector<1x8x128xbf16> to vector<8x128xbf16>
    %17 = vector.shape_cast %14 : vector<8x128xbf16> to vector<1x8x128xbf16>
    tpu.vector_store %arg6[%c0_9, %c0_10, %c0_11], %17 {strides = array<i32>} : memref<1x8x128xbf16, #tpu.memory_space<vmem>>, vector<1x8x128xbf16>,
    %18 = vector.extract_strided_slice %7 {offsets = [0, 256], sizes = [8, 128], strides = [1, 1]} : vector<8x384xf32> to vector<8x128xf32>
    %19 = arith.truncf %18 : vector<8x128xf32> to vector<8x128xbf16>
    %c0_12 = arith.constant 0 : index
    %c0_13 = arith.constant 0 : index
    %c0_14 = arith.constant 0 : index
    %20 = vector.load %arg7[%c0_12, %c0_13, %c0_14] : memref<1x8x128xbf16, #tpu.memory_space<vmem>>, vector<1x8x128xbf16>
    %21 = vector.shape_cast %20 : vector<1x8x128xbf16> to vector<8x128xbf16>
    %22 = vector.shape_cast %19 : vector<8x128xbf16> to vector<1x8x128xbf16>
    tpu.vector_store %arg7[%c0_12, %c0_13, %c0_14], %22 {strides = array<i32>} : memref<1x8x128xbf16, #tpu.memory_space<vmem>>, vector<1x8x128xbf16>,
    return
  }
  func.func @transform_0(%arg0: i32, %arg1: i32) -> (i32, i32, i32) {
    %c0_i32 = arith.constant 0 : i32
    %c0_i32_0 = arith.constant 0 : i32
    return %arg0, %arg1, %c0_i32 : i32, i32, i32
  }
  func.func @transform_1(%arg0: i32, %arg1: i32) -> (i32, i32) {
    %c0_i32 = arith.constant 0 : i32
    %c0_i32_0 = arith.constant 0 : i32
    %c0_i32_1 = arith.constant 0 : i32
    return %c0_i32, %c0_i32_0 : i32, i32
  }
  func.func @transform_2(%arg0: i32, %arg1: i32) -> (i32, i32) {
    %c0_i32 = arith.constant 0 : i32
    %c0_i32_0 = arith.constant 0 : i32
    %c0_i32_1 = arith.constant 0 : i32
    return %c0_i32, %c0_i32_0 : i32, i32
  }
  func.func @transform_3(%arg0: i32, %arg1: i32) -> (i32, i32, i32) {
    %c0_i32 = arith.constant 0 : i32
    %c0_i32_0 = arith.constant 0 : i32
    return %arg0, %arg1, %c0_i32 : i32, i32, i32
  }
  func.func @transform_4(%arg0: i32, %arg1: i32) -> (i32, i32, i32) {
    %c0_i32 = arith.constant 0 : i32
    %c0_i32_0 = arith.constant 0 : i32
    return %arg0, %arg1, %c0_i32 : i32, i32, i32
  }
  func.func @transform_5(%arg0: i32, %arg1: i32) -> (i32, i32, i32) {
    %c0_i32 = arith.constant 0 : i32
    %c0_i32_0 = arith.constant 0 : i32
    return %arg0, %arg1, %c0_i32 : i32, i32, i32
  }
}

module attributes {stable_mosaic.version = 11 : i64} {
  func.func @_encoder_layer_kernel(%arg0: i32, %arg1: i32, %arg2: memref<1x8x128xf32, #tpu.memory_space<vmem>>, %arg3: memref<1x1x8xi32, #tpu.memory_space<vmem>>, %arg4: memref<1x4x8x32xbf16, #tpu.memory_space<vmem>>, %arg5: memref<1x4x8x32xbf16, #tpu.memory_space<vmem>>, %arg6: memref<1x4x8x32xbf16, #tpu.memory_space<vmem>>, %arg7: memref<128x128xbf16, #tpu.memory_space<vmem>>, %arg8: memref<1x128xf32, #tpu.memory_space<vmem>>, %arg9: memref<1x128xf32, #tpu.memory_space<vmem>>, %arg10: memref<1x128xf32, #tpu.memory_space<vmem>>, %arg11: memref<128x256xbf16, #tpu.memory_space<vmem>>, %arg12: memref<1x256xf32, #tpu.memory_space<vmem>>, %arg13: memref<256x128xbf16, #tpu.memory_space<vmem>>, %arg14: memref<1x128xf32, #tpu.memory_space<vmem>>, %arg15: memref<1x128xf32, #tpu.memory_space<vmem>>, %arg16: memref<1x128xf32, #tpu.memory_space<vmem>>, %arg17: memref<1x8x128xf32, #tpu.memory_space<vmem>>) attributes {dimension_semantics = [#tpu.dimension_semantics<parallel>, #tpu.dimension_semantics<parallel>], iteration_bounds = array<i64: 2, 1>, scalar_prefetch = 0 : i64, scratch_operands = 0 : i64, tpu.core_type = #tpu.core_type<tc>, window_params = [{transform_indices = @transform_0, window_bounds = array<i64: 1, 8, 128>}, {transform_indices = @transform_1, window_bounds = array<i64: 1, 1, 8>}, {transform_indices = @transform_2, window_bounds = array<i64: 1, 4, 8, 32>}, {transform_indices = @transform_3, window_bounds = array<i64: 1, 4, 8, 32>}, {transform_indices = @transform_4, window_bounds = array<i64: 1, 4, 8, 32>}, {pipeline_mode = #tpu.pipeline_mode<synchronous>, transform_indices = @transform_5, window_bounds = array<i64: 128, 128>}, {pipeline_mode = #tpu.pipeline_mode<synchronous>, transform_indices = @transform_6, window_bounds = array<i64: 1, 128>}, {pipeline_mode = #tpu.pipeline_mode<synchronous>, transform_indices = @transform_7, window_bounds = array<i64: 1, 128>}, {pipeline_mode = #tpu.pipeline_mode<synchronous>, transform_indices = @transform_8, window_bounds = array<i64: 1, 128>}, {pipeline_mode = #tpu.pipeline_mode<synchronous>, transform_indices = @transform_9, window_bounds = array<i64: 128, 256>}, {pipeline_mode = #tpu.pipeline_mode<synchronous>, transform_indices = @transform_10, window_bounds = array<i64: 1, 256>}, {pipeline_mode = #tpu.pipeline_mode<synchronous>, transform_indices = @transform_11, window_bounds = array<i64: 256, 128>}, {pipeline_mode = #tpu.pipeline_mode<synchronous>, transform_indices = @transform_12, window_bounds = array<i64: 1, 128>}, {pipeline_mode = #tpu.pipeline_mode<synchronous>, transform_indices = @transform_13, window_bounds = array<i64: 1, 128>}, {pipeline_mode = #tpu.pipeline_mode<synchronous>, transform_indices = @transform_14, window_bounds = array<i64: 1, 128>}, {transform_indices = @transform_15, window_bounds = array<i64: 1, 8, 128>}]} {
    %c0 = arith.constant 0 : index
    %c0_0 = arith.constant 0 : index
    %c0_1 = arith.constant 0 : index
    %0 = vector.load %arg2[%c0, %c0_0, %c0_1] : memref<1x8x128xf32, #tpu.memory_space<vmem>>, vector<1x8x128xf32>
    %1 = vector.shape_cast %0 : vector<1x8x128xf32> to vector<8x128xf32>
    %c0_2 = arith.constant 0 : index
    %c0_3 = arith.constant 0 : index
    %c0_4 = arith.constant 0 : index
    %c0_5 = arith.constant 0 : index
    %2 = vector.load %arg4[%c0_2, %c0_3, %c0_4, %c0_5] : memref<1x4x8x32xbf16, #tpu.memory_space<vmem>>, vector<1x4x8x32xbf16>
    %3 = vector.shape_cast %2 : vector<1x4x8x32xbf16> to vector<4x8x32xbf16>
    %c0_6 = arith.constant 0 : index
    %c0_7 = arith.constant 0 : index
    %c0_8 = arith.constant 0 : index
    %c0_9 = arith.constant 0 : index
    %4 = vector.load %arg5[%c0_6, %c0_7, %c0_8, %c0_9] : memref<1x4x8x32xbf16, #tpu.memory_space<vmem>>, vector<1x4x8x32xbf16>
    %5 = vector.shape_cast %4 : vector<1x4x8x32xbf16> to vector<4x8x32xbf16>
    %c0_10 = arith.constant 0 : index
    %c0_11 = arith.constant 0 : index
    %c0_12 = arith.constant 0 : index
    %c0_13 = arith.constant 0 : index
    %6 = vector.load %arg6[%c0_10, %c0_11, %c0_12, %c0_13] : memref<1x4x8x32xbf16, #tpu.memory_space<vmem>>, vector<1x4x8x32xbf16>
    %7 = vector.shape_cast %6 : vector<1x4x8x32xbf16> to vector<4x8x32xbf16>
    "tpu.trace_start"() <{level = 10 : i32, message = "hqd,hkd->hqk"}> : () -> ()
    %cst = arith.constant dense<0.000000e+00> : vector<4x8x8xf32>
    %8 = tpu.matmul %3, %5, %cst {dimension_numbers = #tpu.dot_dimension_numbers<[2], [2], [1], [1], [0, 0, 0, 1, 1, 1], [0], [0]>} : vector<4x8x32xbf16>, vector<4x8x32xbf16>, vector<4x8x8xf32> -> vector<4x8x8xf32>
    "tpu.trace_stop"() : () -> ()
    %c0_14 = arith.constant 0 : index
    %c0_15 = arith.constant 0 : index
    %c0_16 = arith.constant 0 : index
    %9 = vector.load %arg3[%c0_14, %c0_15, %c0_16] : memref<1x1x8xi32, #tpu.memory_space<vmem>>, vector<1x1x8xi32>
    %10 = vector.shape_cast %9 : vector<1x1x8xi32> to vector<1x8xi32>
    %c0_i32 = arith.constant 0 : i32
    %11 = vector.broadcast %c0_i32 : i32 to vector<1x8xi32>
    %12 = arith.cmpi ne, %10, %11 : vector<1x8xi32>
    %cst_17 = arith.constant 0.000000e+00 : f32
    %cst_18 = arith.constant -1.000000e+10 : f32
    %13 = vector.broadcast %cst_17 : f32 to vector<1x8xf32>
    %14 = vector.broadcast %cst_18 : f32 to vector<1x8xf32>
    %15 = arith.select %12, %13, %14 : vector<1x8xi1>, vector<1x8xf32>
    %16 = vector.shape_cast %15 : vector<1x8xf32> to vector<1x1x8xf32>
    %17 = vector.broadcast %16 : vector<1x1x8xf32> to vector<4x8x8xf32>
    %18 = arith.addf %8, %17 : vector<4x8x8xf32>
    %cst_19 = arith.constant dense<0xFF800000> : vector<4x8xf32>
    %19 = vector.multi_reduction <maximumf>, %18, %cst_19 [2] : vector<4x8x8xf32> to vector<4x8xf32>
    %20 = vector.shape_cast %19 : vector<4x8xf32> to vector<4x8x1xf32>
    %21 = vector.broadcast %20 : vector<4x8x1xf32> to vector<4x8x8xf32>
    %22 = arith.subf %18, %21 : vector<4x8x8xf32>
    %23 = math.exp %22 : vector<4x8x8xf32>
    %cst_20 = arith.constant dense<0.000000e+00> : vector<4x8xf32>
    %24 = vector.multi_reduction <add>, %23, %cst_20 [2] : vector<4x8x8xf32> to vector<4x8xf32>
    %25 = vector.shape_cast %24 : vector<4x8xf32> to vector<4x8x1xf32>
    %26 = tpu.reciprocal %25 {approx = true} : vector<4x8x1xf32> -> vector<4x8x1xf32>
    %27 = vector.broadcast %26 : vector<4x8x1xf32> to vector<4x8x8xf32>
    %28 = arith.mulf %23, %27 : vector<4x8x8xf32>
    %29 = arith.truncf %28 : vector<4x8x8xf32> to vector<4x8x8xbf16>
    "tpu.trace_start"() <{level = 10 : i32, message = "hqk,hkd->hqd"}> : () -> ()
    %cst_21 = arith.constant dense<0.000000e+00> : vector<4x8x32xf32>
    %30 = tpu.matmul %29, %7, %cst_21 {dimension_numbers = #tpu.dot_dimension_numbers<[2], [1], [1], [2], [0, 0, 0, 1, 1, 2], [0], [0]>} : vector<4x8x8xbf16>, vector<4x8x32xbf16>, vector<4x8x32xf32> -> vector<4x8x32xf32>
    "tpu.trace_stop"() : () -> ()
    %31 = vector.extract_strided_slice %30 {offsets = [0, 0, 0], sizes = [1, 8, 32], strides = [1, 1, 1]} : vector<4x8x32xf32> to vector<1x8x32xf32>
    %32 = vector.shape_cast %31 : vector<1x8x32xf32> to vector<8x32xf32>
    %33 = vector.extract_strided_slice %30 {offsets = [1, 0, 0], sizes = [1, 8, 32], strides = [1, 1, 1]} : vector<4x8x32xf32> to vector<1x8x32xf32>
    %34 = vector.shape_cast %33 : vector<1x8x32xf32> to vector<8x32xf32>
    %35 = vector.extract_strided_slice %30 {offsets = [2, 0, 0], sizes = [1, 8, 32], strides = [1, 1, 1]} : vector<4x8x32xf32> to vector<1x8x32xf32>
    %36 = vector.shape_cast %35 : vector<1x8x32xf32> to vector<8x32xf32>
    %37 = vector.extract_strided_slice %30 {offsets = [3, 0, 0], sizes = [1, 8, 32], strides = [1, 1, 1]} : vector<4x8x32xf32> to vector<1x8x32xf32>
    %38 = vector.shape_cast %37 : vector<1x8x32xf32> to vector<8x32xf32>
    %39 = tpu.concatenate %32, %34, %36, %38 in 1 : vector<8x32xf32>, vector<8x32xf32>, vector<8x32xf32>, vector<8x32xf32> -> vector<8x128xf32>
    %40 = arith.truncf %39 : vector<8x128xf32> to vector<8x128xbf16>
    %c0_22 = arith.constant 0 : index
    %c0_23 = arith.constant 0 : index
    %41 = vector.load %arg7[%c0_22, %c0_23] : memref<128x128xbf16, #tpu.memory_space<vmem>>, vector<128x128xbf16>
    %cst_24 = arith.constant dense<0.000000e+00> : vector<8x128xf32>
    %42 = tpu.matmul %40, %41, %cst_24 {dimension_numbers = #tpu.dot_dimension_numbers<[1], [0], [0], [1], [0, 0, 1, 1], [], []>} : vector<8x128xbf16>, vector<128x128xbf16>, vector<8x128xf32> -> vector<8x128xf32>
    %c0_25 = arith.constant 0 : index
    %c0_26 = arith.constant 0 : index
    %43 = vector.load %arg8[%c0_25, %c0_26] : memref<1x128xf32, #tpu.memory_space<vmem>>, vector<1x128xf32>
    %44 = vector.broadcast %43 : vector<1x128xf32> to vector<8x128xf32>
    %45 = arith.addf %42, %44 : vector<8x128xf32>
    %46 = arith.addf %1, %45 : vector<8x128xf32>
    %c0_27 = arith.constant 0 : index
    %c0_28 = arith.constant 0 : index
    %47 = vector.load %arg9[%c0_27, %c0_28] : memref<1x128xf32, #tpu.memory_space<vmem>>, vector<1x128xf32>
    %c0_29 = arith.constant 0 : index
    %c0_30 = arith.constant 0 : index
    %48 = vector.load %arg10[%c0_29, %c0_30] : memref<1x128xf32, #tpu.memory_space<vmem>>, vector<1x128xf32>
    %cst_31 = arith.constant dense<0.000000e+00> : vector<8xf32>
    %49 = vector.multi_reduction <add>, %46, %cst_31 [1] : vector<8x128xf32> to vector<8xf32>
    %50 = vector.shape_cast %49 : vector<8xf32> to vector<8x1xf32>
    %cst_32 = arith.constant 1.280000e+02 : f32
    %51 = vector.broadcast %cst_32 : f32 to vector<8x1xf32>
    %52 = arith.divf %50, %51 : vector<8x1xf32>
    %53 = vector.broadcast %52 : vector<8x1xf32> to vector<8x128xf32>
    %54 = arith.subf %46, %53 : vector<8x128xf32>
    %55 = arith.mulf %54, %54 : vector<8x128xf32>
    %cst_33 = arith.constant dense<0.000000e+00> : vector<8xf32>
    %56 = vector.multi_reduction <add>, %55, %cst_33 [1] : vector<8x128xf32> to vector<8xf32>
    %57 = vector.shape_cast %56 : vector<8xf32> to vector<8x1xf32>
    %cst_34 = arith.constant 1.280000e+02 : f32
    %58 = vector.broadcast %cst_34 : f32 to vector<8x1xf32>
    %59 = arith.divf %57, %58 : vector<8x1xf32>
    %60 = vector.broadcast %52 : vector<8x1xf32> to vector<8x128xf32>
    %61 = arith.subf %46, %60 : vector<8x128xf32>
    %cst_35 = arith.constant 9.99999974E-6 : f32
    %62 = vector.broadcast %cst_35 : f32 to vector<8x1xf32>
    %63 = arith.addf %59, %62 : vector<8x1xf32>
    %64 = math.rsqrt %63 : vector<8x1xf32>
    %65 = vector.broadcast %64 : vector<8x1xf32> to vector<8x128xf32>
    %66 = arith.mulf %61, %65 : vector<8x128xf32>
    %67 = vector.broadcast %47 : vector<1x128xf32> to vector<8x128xf32>
    %68 = arith.mulf %66, %67 : vector<8x128xf32>
    %69 = vector.broadcast %48 : vector<1x128xf32> to vector<8x128xf32>
    %70 = arith.addf %68, %69 : vector<8x128xf32>
    %71 = arith.truncf %70 : vector<8x128xf32> to vector<8x128xbf16>
    %c0_36 = arith.constant 0 : index
    %c0_37 = arith.constant 0 : index
    %72 = vector.load %arg11[%c0_36, %c0_37] : memref<128x256xbf16, #tpu.memory_space<vmem>>, vector<128x256xbf16>
    %cst_38 = arith.constant dense<0.000000e+00> : vector<8x256xf32>
    %73 = tpu.matmul %71, %72, %cst_38 {dimension_numbers = #tpu.dot_dimension_numbers<[1], [0], [0], [1], [0, 0, 1, 1], [], []>} : vector<8x128xbf16>, vector<128x256xbf16>, vector<8x256xf32> -> vector<8x256xf32>
    %c0_39 = arith.constant 0 : index
    %c0_40 = arith.constant 0 : index
    %74 = vector.load %arg12[%c0_39, %c0_40] : memref<1x256xf32, #tpu.memory_space<vmem>>, vector<1x256xf32>
    %75 = vector.broadcast %74 : vector<1x256xf32> to vector<8x256xf32>
    %76 = arith.addf %73, %75 : vector<8x256xf32>
    %cst_41 = arith.constant 0.000000e+00 : f32
    %77 = vector.broadcast %cst_41 : f32 to vector<8x256xf32>
    %78 = arith.maximumf %76, %77 : vector<8x256xf32>
    %79 = arith.truncf %78 : vector<8x256xf32> to vector<8x256xbf16>
    %c0_42 = arith.constant 0 : index
    %c0_43 = arith.constant 0 : index
    %80 = vector.load %arg13[%c0_42, %c0_43] : memref<256x128xbf16, #tpu.memory_space<vmem>>, vector<256x128xbf16>
    %cst_44 = arith.constant dense<0.000000e+00> : vector<8x128xf32>
    %81 = tpu.matmul %79, %80, %cst_44 {dimension_numbers = #tpu.dot_dimension_numbers<[1], [0], [0], [1], [0, 0, 1, 1], [], []>} : vector<8x256xbf16>, vector<256x128xbf16>, vector<8x128xf32> -> vector<8x128xf32>
    %c0_45 = arith.constant 0 : index
    %c0_46 = arith.constant 0 : index
    %82 = vector.load %arg14[%c0_45, %c0_46] : memref<1x128xf32, #tpu.memory_space<vmem>>, vector<1x128xf32>
    %83 = vector.broadcast %82 : vector<1x128xf32> to vector<8x128xf32>
    %84 = arith.addf %81, %83 : vector<8x128xf32>
    %85 = arith.addf %70, %84 : vector<8x128xf32>
    %c0_47 = arith.constant 0 : index
    %c0_48 = arith.constant 0 : index
    %86 = vector.load %arg15[%c0_47, %c0_48] : memref<1x128xf32, #tpu.memory_space<vmem>>, vector<1x128xf32>
    %c0_49 = arith.constant 0 : index
    %c0_50 = arith.constant 0 : index
    %87 = vector.load %arg16[%c0_49, %c0_50] : memref<1x128xf32, #tpu.memory_space<vmem>>, vector<1x128xf32>
    %cst_51 = arith.constant dense<0.000000e+00> : vector<8xf32>
    %88 = vector.multi_reduction <add>, %85, %cst_51 [1] : vector<8x128xf32> to vector<8xf32>
    %89 = vector.shape_cast %88 : vector<8xf32> to vector<8x1xf32>
    %cst_52 = arith.constant 1.280000e+02 : f32
    %90 = vector.broadcast %cst_52 : f32 to vector<8x1xf32>
    %91 = arith.divf %89, %90 : vector<8x1xf32>
    %92 = vector.broadcast %91 : vector<8x1xf32> to vector<8x128xf32>
    %93 = arith.subf %85, %92 : vector<8x128xf32>
    %94 = arith.mulf %93, %93 : vector<8x128xf32>
    %cst_53 = arith.constant dense<0.000000e+00> : vector<8xf32>
    %95 = vector.multi_reduction <add>, %94, %cst_53 [1] : vector<8x128xf32> to vector<8xf32>
    %96 = vector.shape_cast %95 : vector<8xf32> to vector<8x1xf32>
    %cst_54 = arith.constant 1.280000e+02 : f32
    %97 = vector.broadcast %cst_54 : f32 to vector<8x1xf32>
    %98 = arith.divf %96, %97 : vector<8x1xf32>
    %99 = vector.broadcast %91 : vector<8x1xf32> to vector<8x128xf32>
    %100 = arith.subf %85, %99 : vector<8x128xf32>
    %cst_55 = arith.constant 9.99999974E-6 : f32
    %101 = vector.broadcast %cst_55 : f32 to vector<8x1xf32>
    %102 = arith.addf %98, %101 : vector<8x1xf32>
    %103 = math.rsqrt %102 : vector<8x1xf32>
    %104 = vector.broadcast %103 : vector<8x1xf32> to vector<8x128xf32>
    %105 = arith.mulf %100, %104 : vector<8x128xf32>
    %106 = vector.broadcast %86 : vector<1x128xf32> to vector<8x128xf32>
    %107 = arith.mulf %105, %106 : vector<8x128xf32>
    %108 = vector.broadcast %87 : vector<1x128xf32> to vector<8x128xf32>
    %109 = arith.addf %107, %108 : vector<8x128xf32>
    %c0_56 = arith.constant 0 : index
    %c0_57 = arith.constant 0 : index
    %c0_58 = arith.constant 0 : index
    %110 = vector.load %arg17[%c0_56, %c0_57, %c0_58] : memref<1x8x128xf32, #tpu.memory_space<vmem>>, vector<1x8x128xf32>
    %111 = vector.shape_cast %110 : vector<1x8x128xf32> to vector<8x128xf32>
    %112 = vector.shape_cast %109 : vector<8x128xf32> to vector<1x8x128xf32>
    tpu.vector_store %arg17[%c0_56, %c0_57, %c0_58], %112 {strides = array<i32>} : memref<1x8x128xf32, #tpu.memory_space<vmem>>, vector<1x8x128xf32>,
    return
  }
  func.func @transform_0(%arg0: i32, %arg1: i32) -> (i32, i32, i32) {
    %c0_i32 = arith.constant 0 : i32
    %c0_i32_0 = arith.constant 0 : i32
    return %arg0, %arg1, %c0_i32 : i32, i32, i32
  }
  func.func @transform_1(%arg0: i32, %arg1: i32) -> (i32, i32, i32) {
    %c0_i32 = arith.constant 0 : i32
    %c0_i32_0 = arith.constant 0 : i32
    %c0_i32_1 = arith.constant 0 : i32
    return %arg0, %c0_i32, %c0_i32_0 : i32, i32, i32
  }
  func.func @transform_2(%arg0: i32, %arg1: i32) -> (i32, i32, i32, i32) {
    %c0_i32 = arith.constant 0 : i32
    %c0_i32_0 = arith.constant 0 : i32
    %c0_i32_1 = arith.constant 0 : i32
    return %arg0, %c0_i32, %arg1, %c0_i32_0 : i32, i32, i32, i32
  }
  func.func @transform_3(%arg0: i32, %arg1: i32) -> (i32, i32, i32, i32) {
    %c0_i32 = arith.constant 0 : i32
    %c0_i32_0 = arith.constant 0 : i32
    %c0_i32_1 = arith.constant 0 : i32
    %c0_i32_2 = arith.constant 0 : i32
    return %arg0, %c0_i32, %c0_i32_0, %c0_i32_1 : i32, i32, i32, i32
  }
  func.func @transform_4(%arg0: i32, %arg1: i32) -> (i32, i32, i32, i32) {
    %c0_i32 = arith.constant 0 : i32
    %c0_i32_0 = arith.constant 0 : i32
    %c0_i32_1 = arith.constant 0 : i32
    %c0_i32_2 = arith.constant 0 : i32
    return %arg0, %c0_i32, %c0_i32_0, %c0_i32_1 : i32, i32, i32, i32
  }
  func.func @transform_5(%arg0: i32, %arg1: i32) -> (i32, i32) {
    %c0_i32 = arith.constant 0 : i32
    %c0_i32_0 = arith.constant 0 : i32
    %c0_i32_1 = arith.constant 0 : i32
    return %c0_i32, %c0_i32_0 : i32, i32
  }
  func.func @transform_6(%arg0: i32, %arg1: i32) -> (i32, i32) {
    %c0_i32 = arith.constant 0 : i32
    %c0_i32_0 = arith.constant 0 : i32
    %c0_i32_1 = arith.constant 0 : i32
    return %c0_i32, %c0_i32_0 : i32, i32
  }
  func.func @transform_7(%arg0: i32, %arg1: i32) -> (i32, i32) {
    %c0_i32 = arith.constant 0 : i32
    %c0_i32_0 = arith.constant 0 : i32
    %c0_i32_1 = arith.constant 0 : i32
    return %c0_i32, %c0_i32_0 : i32, i32
  }
  func.func @transform_8(%arg0: i32, %arg1: i32) -> (i32, i32) {
    %c0_i32 = arith.constant 0 : i32
    %c0_i32_0 = arith.constant 0 : i32
    %c0_i32_1 = arith.constant 0 : i32
    return %c0_i32, %c0_i32_0 : i32, i32
  }
  func.func @transform_9(%arg0: i32, %arg1: i32) -> (i32, i32) {
    %c0_i32 = arith.constant 0 : i32
    %c0_i32_0 = arith.constant 0 : i32
    %c0_i32_1 = arith.constant 0 : i32
    return %c0_i32, %c0_i32_0 : i32, i32
  }
  func.func @transform_10(%arg0: i32, %arg1: i32) -> (i32, i32) {
    %c0_i32 = arith.constant 0 : i32
    %c0_i32_0 = arith.constant 0 : i32
    %c0_i32_1 = arith.constant 0 : i32
    return %c0_i32, %c0_i32_0 : i32, i32
  }
  func.func @transform_11(%arg0: i32, %arg1: i32) -> (i32, i32) {
    %c0_i32 = arith.constant 0 : i32
    %c0_i32_0 = arith.constant 0 : i32
    %c0_i32_1 = arith.constant 0 : i32
    return %c0_i32, %c0_i32_0 : i32, i32
  }
  func.func @transform_12(%arg0: i32, %arg1: i32) -> (i32, i32) {
    %c0_i32 = arith.constant 0 : i32
    %c0_i32_0 = arith.constant 0 : i32
    %c0_i32_1 = arith.constant 0 : i32
    return %c0_i32, %c0_i32_0 : i32, i32
  }
  func.func @transform_13(%arg0: i32, %arg1: i32) -> (i32, i32) {
    %c0_i32 = arith.constant 0 : i32
    %c0_i32_0 = arith.constant 0 : i32
    %c0_i32_1 = arith.constant 0 : i32
    return %c0_i32, %c0_i32_0 : i32, i32
  }
  func.func @transform_14(%arg0: i32, %arg1: i32) -> (i32, i32) {
    %c0_i32 = arith.constant 0 : i32
    %c0_i32_0 = arith.constant 0 : i32
    %c0_i32_1 = arith.constant 0 : i32
    return %c0_i32, %c0_i32_0 : i32, i32
  }
  func.func @transform_15(%arg0: i32, %arg1: i32) -> (i32, i32, i32) {
    %c0_i32 = arith.constant 0 : i32
    %c0_i32_0 = arith.constant 0 : i32
    return %arg0, %arg1, %c0_i32 : i32, i32, i32
  }
}

module attributes {stable_mosaic.version = 11 : i64} {
  func.func @_encoder_layer_kernel(%arg0: i32, %arg1: i32, %arg2: memref<1x8x128xf32, #tpu.memory_space<vmem>>, %arg3: memref<1x1x8xi32, #tpu.memory_space<vmem>>, %arg4: memref<1x4x8x32xbf16, #tpu.memory_space<vmem>>, %arg5: memref<1x4x8x32xbf16, #tpu.memory_space<vmem>>, %arg6: memref<1x4x8x32xbf16, #tpu.memory_space<vmem>>, %arg7: memref<128x128xbf16, #tpu.memory_space<vmem>>, %arg8: memref<1x128xf32, #tpu.memory_space<vmem>>, %arg9: memref<1x128xf32, #tpu.memory_space<vmem>>, %arg10: memref<1x128xf32, #tpu.memory_space<vmem>>, %arg11: memref<128x256xbf16, #tpu.memory_space<vmem>>, %arg12: memref<1x256xf32, #tpu.memory_space<vmem>>, %arg13: memref<256x128xbf16, #tpu.memory_space<vmem>>, %arg14: memref<1x128xf32, #tpu.memory_space<vmem>>, %arg15: memref<1x128xf32, #tpu.memory_space<vmem>>, %arg16: memref<1x128xf32, #tpu.memory_space<vmem>>, %arg17: memref<1x8x128xf32, #tpu.memory_space<vmem>>) attributes {dimension_semantics = [#tpu.dimension_semantics<parallel>, #tpu.dimension_semantics<parallel>], iteration_bounds = array<i64: 2, 1>, scalar_prefetch = 0 : i64, scratch_operands = 0 : i64, tpu.core_type = #tpu.core_type<tc>, window_params = [{transform_indices = @transform_0, window_bounds = array<i64: 1, 8, 128>}, {transform_indices = @transform_1, window_bounds = array<i64: 1, 1, 8>}, {transform_indices = @transform_2, window_bounds = array<i64: 1, 4, 8, 32>}, {transform_indices = @transform_3, window_bounds = array<i64: 1, 4, 8, 32>}, {transform_indices = @transform_4, window_bounds = array<i64: 1, 4, 8, 32>}, {pipeline_mode = #tpu.pipeline_mode<synchronous>, transform_indices = @transform_5, window_bounds = array<i64: 128, 128>}, {pipeline_mode = #tpu.pipeline_mode<synchronous>, transform_indices = @transform_6, window_bounds = array<i64: 1, 128>}, {pipeline_mode = #tpu.pipeline_mode<synchronous>, transform_indices = @transform_7, window_bounds = array<i64: 1, 128>}, {pipeline_mode = #tpu.pipeline_mode<synchronous>, transform_indices = @transform_8, window_bounds = array<i64: 1, 128>}, {pipeline_mode = #tpu.pipeline_mode<synchronous>, transform_indices = @transform_9, window_bounds = array<i64: 128, 256>}, {pipeline_mode = #tpu.pipeline_mode<synchronous>, transform_indices = @transform_10, window_bounds = array<i64: 1, 256>}, {pipeline_mode = #tpu.pipeline_mode<synchronous>, transform_indices = @transform_11, window_bounds = array<i64: 256, 128>}, {pipeline_mode = #tpu.pipeline_mode<synchronous>, transform_indices = @transform_12, window_bounds = array<i64: 1, 128>}, {pipeline_mode = #tpu.pipeline_mode<synchronous>, transform_indices = @transform_13, window_bounds = array<i64: 1, 128>}, {pipeline_mode = #tpu.pipeline_mode<synchronous>, transform_indices = @transform_14, window_bounds = array<i64: 1, 128>}, {transform_indices = @transform_15, window_bounds = array<i64: 1, 8, 128>}]} {
    %c0 = arith.constant 0 : index
    %c0_0 = arith.constant 0 : index
    %c0_1 = arith.constant 0 : index
    %0 = vector.load %arg2[%c0, %c0_0, %c0_1] : memref<1x8x128xf32, #tpu.memory_space<vmem>>, vector<1x8x128xf32>
    %1 = vector.shape_cast %0 : vector<1x8x128xf32> to vector<8x128xf32>
    %c0_2 = arith.constant 0 : index
    %c0_3 = arith.constant 0 : index
    %c0_4 = arith.constant 0 : index
    %c0_5 = arith.constant 0 : index
    %2 = vector.load %arg4[%c0_2, %c0_3, %c0_4, %c0_5] : memref<1x4x8x32xbf16, #tpu.memory_space<vmem>>, vector<1x4x8x32xbf16>
    %3 = vector.shape_cast %2 : vector<1x4x8x32xbf16> to vector<4x8x32xbf16>
    %c0_6 = arith.constant 0 : index
    %c0_7 = arith.constant 0 : index
    %c0_8 = arith.constant 0 : index
    %c0_9 = arith.constant 0 : index
    %4 = vector.load %arg5[%c0_6, %c0_7, %c0_8, %c0_9] : memref<1x4x8x32xbf16, #tpu.memory_space<vmem>>, vector<1x4x8x32xbf16>
    %5 = vector.shape_cast %4 : vector<1x4x8x32xbf16> to vector<4x8x32xbf16>
    %c0_10 = arith.constant 0 : index
    %c0_11 = arith.constant 0 : index
    %c0_12 = arith.constant 0 : index
    %c0_13 = arith.constant 0 : index
    %6 = vector.load %arg6[%c0_10, %c0_11, %c0_12, %c0_13] : memref<1x4x8x32xbf16, #tpu.memory_space<vmem>>, vector<1x4x8x32xbf16>
    %7 = vector.shape_cast %6 : vector<1x4x8x32xbf16> to vector<4x8x32xbf16>
    "tpu.trace_start"() <{level = 10 : i32, message = "hqd,hkd->hqk"}> : () -> ()
    %cst = arith.constant dense<0.000000e+00> : vector<4x8x8xf32>
    %8 = tpu.matmul %3, %5, %cst {dimension_numbers = #tpu.dot_dimension_numbers<[2], [2], [1], [1], [0, 0, 0, 1, 1, 1], [0], [0]>} : vector<4x8x32xbf16>, vector<4x8x32xbf16>, vector<4x8x8xf32> -> vector<4x8x8xf32>
    "tpu.trace_stop"() : () -> ()
    %c0_14 = arith.constant 0 : index
    %c0_15 = arith.constant 0 : index
    %c0_16 = arith.constant 0 : index
    %9 = vector.load %arg3[%c0_14, %c0_15, %c0_16] : memref<1x1x8xi32, #tpu.memory_space<vmem>>, vector<1x1x8xi32>
    %10 = vector.shape_cast %9 : vector<1x1x8xi32> to vector<1x8xi32>
    %c0_i32 = arith.constant 0 : i32
    %11 = vector.broadcast %c0_i32 : i32 to vector<1x8xi32>
    %12 = arith.cmpi ne, %10, %11 : vector<1x8xi32>
    %cst_17 = arith.constant 0.000000e+00 : f32
    %cst_18 = arith.constant -1.000000e+10 : f32
    %13 = vector.broadcast %cst_17 : f32 to vector<1x8xf32>
    %14 = vector.broadcast %cst_18 : f32 to vector<1x8xf32>
    %15 = arith.select %12, %13, %14 : vector<1x8xi1>, vector<1x8xf32>
    %16 = vector.shape_cast %15 : vector<1x8xf32> to vector<1x1x8xf32>
    %17 = vector.broadcast %16 : vector<1x1x8xf32> to vector<4x8x8xf32>
    %18 = arith.addf %8, %17 : vector<4x8x8xf32>
    %cst_19 = arith.constant dense<0xFF800000> : vector<4x8xf32>
    %19 = vector.multi_reduction <maximumf>, %18, %cst_19 [2] : vector<4x8x8xf32> to vector<4x8xf32>
    %20 = vector.shape_cast %19 : vector<4x8xf32> to vector<4x8x1xf32>
    %21 = vector.broadcast %20 : vector<4x8x1xf32> to vector<4x8x8xf32>
    %22 = arith.subf %18, %21 : vector<4x8x8xf32>
    %23 = math.exp %22 : vector<4x8x8xf32>
    %cst_20 = arith.constant dense<0.000000e+00> : vector<4x8xf32>
    %24 = vector.multi_reduction <add>, %23, %cst_20 [2] : vector<4x8x8xf32> to vector<4x8xf32>
    %25 = vector.shape_cast %24 : vector<4x8xf32> to vector<4x8x1xf32>
    %26 = tpu.reciprocal %25 {approx = true} : vector<4x8x1xf32> -> vector<4x8x1xf32>
    %27 = vector.broadcast %26 : vector<4x8x1xf32> to vector<4x8x8xf32>
    %28 = arith.mulf %23, %27 : vector<4x8x8xf32>
    %29 = arith.truncf %28 : vector<4x8x8xf32> to vector<4x8x8xbf16>
    "tpu.trace_start"() <{level = 10 : i32, message = "hqk,hkd->hqd"}> : () -> ()
    %cst_21 = arith.constant dense<0.000000e+00> : vector<4x8x32xf32>
    %30 = tpu.matmul %29, %7, %cst_21 {dimension_numbers = #tpu.dot_dimension_numbers<[2], [1], [1], [2], [0, 0, 0, 1, 1, 2], [0], [0]>} : vector<4x8x8xbf16>, vector<4x8x32xbf16>, vector<4x8x32xf32> -> vector<4x8x32xf32>
    "tpu.trace_stop"() : () -> ()
    %31 = vector.extract_strided_slice %30 {offsets = [0, 0, 0], sizes = [1, 8, 32], strides = [1, 1, 1]} : vector<4x8x32xf32> to vector<1x8x32xf32>
    %32 = vector.shape_cast %31 : vector<1x8x32xf32> to vector<8x32xf32>
    %33 = vector.extract_strided_slice %30 {offsets = [1, 0, 0], sizes = [1, 8, 32], strides = [1, 1, 1]} : vector<4x8x32xf32> to vector<1x8x32xf32>
    %34 = vector.shape_cast %33 : vector<1x8x32xf32> to vector<8x32xf32>
    %35 = vector.extract_strided_slice %30 {offsets = [2, 0, 0], sizes = [1, 8, 32], strides = [1, 1, 1]} : vector<4x8x32xf32> to vector<1x8x32xf32>
    %36 = vector.shape_cast %35 : vector<1x8x32xf32> to vector<8x32xf32>
    %37 = vector.extract_strided_slice %30 {offsets = [3, 0, 0], sizes = [1, 8, 32], strides = [1, 1, 1]} : vector<4x8x32xf32> to vector<1x8x32xf32>
    %38 = vector.shape_cast %37 : vector<1x8x32xf32> to vector<8x32xf32>
    %39 = tpu.concatenate %32, %34, %36, %38 in 1 : vector<8x32xf32>, vector<8x32xf32>, vector<8x32xf32>, vector<8x32xf32> -> vector<8x128xf32>
    %40 = arith.truncf %39 : vector<8x128xf32> to vector<8x128xbf16>
    %c0_22 = arith.constant 0 : index
    %c0_23 = arith.constant 0 : index
    %41 = vector.load %arg7[%c0_22, %c0_23] : memref<128x128xbf16, #tpu.memory_space<vmem>>, vector<128x128xbf16>
    %cst_24 = arith.constant dense<0.000000e+00> : vector<8x128xf32>
    %42 = tpu.matmul %40, %41, %cst_24 {dimension_numbers = #tpu.dot_dimension_numbers<[1], [0], [0], [1], [0, 0, 1, 1], [], []>} : vector<8x128xbf16>, vector<128x128xbf16>, vector<8x128xf32> -> vector<8x128xf32>
    %c0_25 = arith.constant 0 : index
    %c0_26 = arith.constant 0 : index
    %43 = vector.load %arg8[%c0_25, %c0_26] : memref<1x128xf32, #tpu.memory_space<vmem>>, vector<1x128xf32>
    %44 = vector.broadcast %43 : vector<1x128xf32> to vector<8x128xf32>
    %45 = arith.addf %42, %44 : vector<8x128xf32>
    %46 = arith.addf %1, %45 : vector<8x128xf32>
    %c0_27 = arith.constant 0 : index
    %c0_28 = arith.constant 0 : index
    %47 = vector.load %arg9[%c0_27, %c0_28] : memref<1x128xf32, #tpu.memory_space<vmem>>, vector<1x128xf32>
    %c0_29 = arith.constant 0 : index
    %c0_30 = arith.constant 0 : index
    %48 = vector.load %arg10[%c0_29, %c0_30] : memref<1x128xf32, #tpu.memory_space<vmem>>, vector<1x128xf32>
    %cst_31 = arith.constant dense<0.000000e+00> : vector<8xf32>
    %49 = vector.multi_reduction <add>, %46, %cst_31 [1] : vector<8x128xf32> to vector<8xf32>
    %50 = vector.shape_cast %49 : vector<8xf32> to vector<8x1xf32>
    %cst_32 = arith.constant 1.280000e+02 : f32
    %51 = vector.broadcast %cst_32 : f32 to vector<8x1xf32>
    %52 = arith.divf %50, %51 : vector<8x1xf32>
    %53 = vector.broadcast %52 : vector<8x1xf32> to vector<8x128xf32>
    %54 = arith.subf %46, %53 : vector<8x128xf32>
    %55 = arith.mulf %54, %54 : vector<8x128xf32>
    %cst_33 = arith.constant dense<0.000000e+00> : vector<8xf32>
    %56 = vector.multi_reduction <add>, %55, %cst_33 [1] : vector<8x128xf32> to vector<8xf32>
    %57 = vector.shape_cast %56 : vector<8xf32> to vector<8x1xf32>
    %cst_34 = arith.constant 1.280000e+02 : f32
    %58 = vector.broadcast %cst_34 : f32 to vector<8x1xf32>
    %59 = arith.divf %57, %58 : vector<8x1xf32>
    %60 = vector.broadcast %52 : vector<8x1xf32> to vector<8x128xf32>
    %61 = arith.subf %46, %60 : vector<8x128xf32>
    %cst_35 = arith.constant 9.99999974E-6 : f32
    %62 = vector.broadcast %cst_35 : f32 to vector<8x1xf32>
    %63 = arith.addf %59, %62 : vector<8x1xf32>
    %64 = math.rsqrt %63 : vector<8x1xf32>
    %65 = vector.broadcast %64 : vector<8x1xf32> to vector<8x128xf32>
    %66 = arith.mulf %61, %65 : vector<8x128xf32>
    %67 = vector.broadcast %47 : vector<1x128xf32> to vector<8x128xf32>
    %68 = arith.mulf %66, %67 : vector<8x128xf32>
    %69 = vector.broadcast %48 : vector<1x128xf32> to vector<8x128xf32>
    %70 = arith.addf %68, %69 : vector<8x128xf32>
    %71 = arith.truncf %70 : vector<8x128xf32> to vector<8x128xbf16>
    %c0_36 = arith.constant 0 : index
    %c0_37 = arith.constant 0 : index
    %72 = vector.load %arg11[%c0_36, %c0_37] : memref<128x256xbf16, #tpu.memory_space<vmem>>, vector<128x256xbf16>
    %cst_38 = arith.constant dense<0.000000e+00> : vector<8x256xf32>
    %73 = tpu.matmul %71, %72, %cst_38 {dimension_numbers = #tpu.dot_dimension_numbers<[1], [0], [0], [1], [0, 0, 1, 1], [], []>} : vector<8x128xbf16>, vector<128x256xbf16>, vector<8x256xf32> -> vector<8x256xf32>
    %c0_39 = arith.constant 0 : index
    %c0_40 = arith.constant 0 : index
    %74 = vector.load %arg12[%c0_39, %c0_40] : memref<1x256xf32, #tpu.memory_space<vmem>>, vector<1x256xf32>
    %75 = vector.broadcast %74 : vector<1x256xf32> to vector<8x256xf32>
    %76 = arith.addf %73, %75 : vector<8x256xf32>
    %cst_41 = arith.constant 0.000000e+00 : f32
    %77 = vector.broadcast %cst_41 : f32 to vector<8x256xf32>
    %78 = arith.maximumf %76, %77 : vector<8x256xf32>
    %79 = arith.truncf %78 : vector<8x256xf32> to vector<8x256xbf16>
    %c0_42 = arith.constant 0 : index
    %c0_43 = arith.constant 0 : index
    %80 = vector.load %arg13[%c0_42, %c0_43] : memref<256x128xbf16, #tpu.memory_space<vmem>>, vector<256x128xbf16>
    %cst_44 = arith.constant dense<0.000000e+00> : vector<8x128xf32>
    %81 = tpu.matmul %79, %80, %cst_44 {dimension_numbers = #tpu.dot_dimension_numbers<[1], [0], [0], [1], [0, 0, 1, 1], [], []>} : vector<8x256xbf16>, vector<256x128xbf16>, vector<8x128xf32> -> vector<8x128xf32>
    %c0_45 = arith.constant 0 : index
    %c0_46 = arith.constant 0 : index
    %82 = vector.load %arg14[%c0_45, %c0_46] : memref<1x128xf32, #tpu.memory_space<vmem>>, vector<1x128xf32>
    %83 = vector.broadcast %82 : vector<1x128xf32> to vector<8x128xf32>
    %84 = arith.addf %81, %83 : vector<8x128xf32>
    %85 = arith.addf %70, %84 : vector<8x128xf32>
    %c0_47 = arith.constant 0 : index
    %c0_48 = arith.constant 0 : index
    %86 = vector.load %arg15[%c0_47, %c0_48] : memref<1x128xf32, #tpu.memory_space<vmem>>, vector<1x128xf32>
    %c0_49 = arith.constant 0 : index
    %c0_50 = arith.constant 0 : index
    %87 = vector.load %arg16[%c0_49, %c0_50] : memref<1x128xf32, #tpu.memory_space<vmem>>, vector<1x128xf32>
    %cst_51 = arith.constant dense<0.000000e+00> : vector<8xf32>
    %88 = vector.multi_reduction <add>, %85, %cst_51 [1] : vector<8x128xf32> to vector<8xf32>
    %89 = vector.shape_cast %88 : vector<8xf32> to vector<8x1xf32>
    %cst_52 = arith.constant 1.280000e+02 : f32
    %90 = vector.broadcast %cst_52 : f32 to vector<8x1xf32>
    %91 = arith.divf %89, %90 : vector<8x1xf32>
    %92 = vector.broadcast %91 : vector<8x1xf32> to vector<8x128xf32>
    %93 = arith.subf %85, %92 : vector<8x128xf32>
    %94 = arith.mulf %93, %93 : vector<8x128xf32>
    %cst_53 = arith.constant dense<0.000000e+00> : vector<8xf32>
    %95 = vector.multi_reduction <add>, %94, %cst_53 [1] : vector<8x128xf32> to vector<8xf32>
    %96 = vector.shape_cast %95 : vector<8xf32> to vector<8x1xf32>
    %cst_54 = arith.constant 1.280000e+02 : f32
    %97 = vector.broadcast %cst_54 : f32 to vector<8x1xf32>
    %98 = arith.divf %96, %97 : vector<8x1xf32>
    %99 = vector.broadcast %91 : vector<8x1xf32> to vector<8x128xf32>
    %100 = arith.subf %85, %99 : vector<8x128xf32>
    %cst_55 = arith.constant 9.99999974E-6 : f32
    %101 = vector.broadcast %cst_55 : f32 to vector<8x1xf32>
    %102 = arith.addf %98, %101 : vector<8x1xf32>
    %103 = math.rsqrt %102 : vector<8x1xf32>
    %104 = vector.broadcast %103 : vector<8x1xf32> to vector<8x128xf32>
    %105 = arith.mulf %100, %104 : vector<8x128xf32>
    %106 = vector.broadcast %86 : vector<1x128xf32> to vector<8x128xf32>
    %107 = arith.mulf %105, %106 : vector<8x128xf32>
    %108 = vector.broadcast %87 : vector<1x128xf32> to vector<8x128xf32>
    %109 = arith.addf %107, %108 : vector<8x128xf32>
    %c0_56 = arith.constant 0 : index
    %c0_57 = arith.constant 0 : index
    %c0_58 = arith.constant 0 : index
    %110 = vector.load %arg17[%c0_56, %c0_57, %c0_58] : memref<1x8x128xf32, #tpu.memory_space<vmem>>, vector<1x8x128xf32>
    %111 = vector.shape_cast %110 : vector<1x8x128xf32> to vector<8x128xf32>
    %112 = vector.shape_cast %109 : vector<8x128xf32> to vector<1x8x128xf32>
    tpu.vector_store %arg17[%c0_56, %c0_57, %c0_58], %112 {strides = array<i32>} : memref<1x8x128xf32, #tpu.memory_space<vmem>>, vector<1x8x128xf32>,
    return
  }
  func.func @transform_0(%arg0: i32, %arg1: i32) -> (i32, i32, i32) {
    %c0_i32 = arith.constant 0 : i32
    %c0_i32_0 = arith.constant 0 : i32
    return %arg0, %arg1, %c0_i32 : i32, i32, i32
  }
  func.func @transform_1(%arg0: i32, %arg1: i32) -> (i32, i32, i32) {
    %c0_i32 = arith.constant 0 : i32
    %c0_i32_0 = arith.constant 0 : i32
    %c0_i32_1 = arith.constant 0 : i32
    return %arg0, %c0_i32, %c0_i32_0 : i32, i32, i32
  }
  func.func @transform_2(%arg0: i32, %arg1: i32) -> (i32, i32, i32, i32) {
    %c0_i32 = arith.constant 0 : i32
    %c0_i32_0 = arith.constant 0 : i32
    %c0_i32_1 = arith.constant 0 : i32
    return %arg0, %c0_i32, %arg1, %c0_i32_0 : i32, i32, i32, i32
  }
  func.func @transform_3(%arg0: i32, %arg1: i32) -> (i32, i32, i32, i32) {
    %c0_i32 = arith.constant 0 : i32
    %c0_i32_0 = arith.constant 0 : i32
    %c0_i32_1 = arith.constant 0 : i32
    %c0_i32_2 = arith.constant 0 : i32
    return %arg0, %c0_i32, %c0_i32_0, %c0_i32_1 : i32, i32, i32, i32
  }
  func.func @transform_4(%arg0: i32, %arg1: i32) -> (i32, i32, i32, i32) {
    %c0_i32 = arith.constant 0 : i32
    %c0_i32_0 = arith.constant 0 : i32
    %c0_i32_1 = arith.constant 0 : i32
    %c0_i32_2 = arith.constant 0 : i32
    return %arg0, %c0_i32, %c0_i32_0, %c0_i32_1 : i32, i32, i32, i32
  }
  func.func @transform_5(%arg0: i32, %arg1: i32) -> (i32, i32) {
    %c0_i32 = arith.constant 0 : i32
    %c0_i32_0 = arith.constant 0 : i32
    %c0_i32_1 = arith.constant 0 : i32
    return %c0_i32, %c0_i32_0 : i32, i32
  }
  func.func @transform_6(%arg0: i32, %arg1: i32) -> (i32, i32) {
    %c0_i32 = arith.constant 0 : i32
    %c0_i32_0 = arith.constant 0 : i32
    %c0_i32_1 = arith.constant 0 : i32
    return %c0_i32, %c0_i32_0 : i32, i32
  }
  func.func @transform_7(%arg0: i32, %arg1: i32) -> (i32, i32) {
    %c0_i32 = arith.constant 0 : i32
    %c0_i32_0 = arith.constant 0 : i32
    %c0_i32_1 = arith.constant 0 : i32
    return %c0_i32, %c0_i32_0 : i32, i32
  }
  func.func @transform_8(%arg0: i32, %arg1: i32) -> (i32, i32) {
    %c0_i32 = arith.constant 0 : i32
    %c0_i32_0 = arith.constant 0 : i32
    %c0_i32_1 = arith.constant 0 : i32
    return %c0_i32, %c0_i32_0 : i32, i32
  }
  func.func @transform_9(%arg0: i32, %arg1: i32) -> (i32, i32) {
    %c0_i32 = arith.constant 0 : i32
    %c0_i32_0 = arith.constant 0 : i32
    %c0_i32_1 = arith.constant 0 : i32
    return %c0_i32, %c0_i32_0 : i32, i32
  }
  func.func @transform_10(%arg0: i32, %arg1: i32) -> (i32, i32) {
    %c0_i32 = arith.constant 0 : i32
    %c0_i32_0 = arith.constant 0 : i32
    %c0_i32_1 = arith.constant 0 : i32
    return %c0_i32, %c0_i32_0 : i32, i32
  }
  func.func @transform_11(%arg0: i32, %arg1: i32) -> (i32, i32) {
    %c0_i32 = arith.constant 0 : i32
    %c0_i32_0 = arith.constant 0 : i32
    %c0_i32_1 = arith.constant 0 : i32
    return %c0_i32, %c0_i32_0 : i32, i32
  }
  func.func @transform_12(%arg0: i32, %arg1: i32) -> (i32, i32) {
    %c0_i32 = arith.constant 0 : i32
    %c0_i32_0 = arith.constant 0 : i32
    %c0_i32_1 = arith.constant 0 : i32
    return %c0_i32, %c0_i32_0 : i32, i32
  }
  func.func @transform_13(%arg0: i32, %arg1: i32) -> (i32, i32) {
    %c0_i32 = arith.constant 0 : i32
    %c0_i32_0 = arith.constant 0 : i32
    %c0_i32_1 = arith.constant 0 : i32
    return %c0_i32, %c0_i32_0 : i32, i32
  }
  func.func @transform_14(%arg0: i32, %arg1: i32) -> (i32, i32) {
    %c0_i32 = arith.constant 0 : i32
    %c0_i32_0 = arith.constant 0 : i32
    %c0_i32_1 = arith.constant 0 : i32
    return %c0_i32, %c0_i32_0 : i32, i32
  }
  func.func @transform_15(%arg0: i32, %arg1: i32) -> (i32, i32, i32) {
    %c0_i32 = arith.constant 0 : i32
    %c0_i32_0 = arith.constant 0 : i32
    return %arg0, %arg1, %c0_i32 : i32, i32, i32
  }
}

</mosaic_0001>

<bundles_post_ra>
// kernel: encoder_forward.4
= control target key start
LH: loop header
LB: loop body
LE: loop exit
PB: predicated region body
PF: predicated region fallthrough
CT: control target
= control target key end

     0   :  { %s891_s18 = smov 0   ;;  %s893_s19 = smov 0   ;;  %s1013_s0 = inlined_call_operand.vmem [shape: f32[2,8,128], index: 0, kind: input, shape index: {}]   ;;  %s1014_s1 = inlined_call_operand.vmem [shape: bf16[128,384], index: 1, kind: input, shape index: {}]   ;;  %s1015_s2 = inlined_call_operand.vmem [shape: f32[1,384], index: 2, kind: input, shape index: {}]   ;;  %s1016_s3 = inlined_call_operand.vmem [shape: bf16[2,8,128], index: 3, kind: output, shape index: {0}]   ;;  %s1017_s4 = inlined_call_operand.vmem [shape: bf16[2,8,128], index: 4, kind: output, shape index: {1}]   ;;  %s1018_s5 = inlined_call_operand.vmem [shape: bf16[2,8,128], index: 5, kind: output, shape index: {2}]  }
   0x1   :  { %s895_s20 = smov 0  }
   0x2 LB: > { %s28_s21 = sadd.s32 1, %s852_s19  ;;  %p715_p0 = scmp.ge.s32.totalorder %s856_s20, 1  ;;  %s856_s20 = sphi %s895_s20, %s16_s20   ;;  %s852_s19 = sphi %s893_s19, %s1020_s19   ;;  %s848_s18 = sphi %s891_s18, %s1019_s18  }
   0x3   : > { %p30_p1 = scmp.ge.s32.totalorder %s28_s21, 2  ;;  %p214_p2 = scmp.lt.s32.totalorder %s856_s20, 3 }
   0x5   : > { %s1022_s21 = smov (%p30_p1, %s28_s21), 0  ;;  %p215_p3 = pnand %p715_p0, %p214_p2 }
   0x6   : > { %p260_p4 = scmp.lt.s32.totalorder (!%p215_p3), %s848_s18, 1 }
   0x7   : > { %218 = sbr.rel (%p215_p3) target bundleno = 246 (0xf6), region = 32 }
   0xc   : > { %v802_v0 = vld [vmem:[%s1014_s1 + $0xac] ss:$12 sps:$4 sm:$0xff]   ;;  %v858_v1 = vmov 0.0   ;;  %v804_v2 = vld [vmem:[%s1014_s1 + $0xb0] ss:$12 sps:$4 sm:$0xff]   ;;  %vm859_vm0 = vmmov 0   ;;  %v325_v28 = vlaneseq }
   0xd   : > { %755 = vmatprep.subr.bf16.mxu1 %v858_v1  ;;  %771 = vmatprep.mubr.msk.bf16.mxu1 %vm859_vm0, %v858_v1  ;;  %v805_v3 = vld [vmem:[%s1014_s1 + $0xa8] ss:$12 sps:$4 sm:$0xff]   ;;  %v860_v5 = vmov 0   ;;  %v808_v6 = vld [vmem:[%s1014_s1 + $0x98] ss:$12 sps:$4 sm:$0xff]   ;;  %s1024_s18 = smov (!%p260_p4, %s848_s18), 1 }
   0xe   : > { %468 = vmatprep.subr.bf16.mxu0 %v802_v0  ;;  %756 = vmatpush3.bf16.msra.mxu1 %v804_v2  ;;  %v806_v4 = vld [vmem:[%s1014_s1 + $0x94] ss:$12 sps:$4 sm:$0xff]   ;;  %v809_v7 = vld [vmem:[%s1014_s1 + $0x90] ss:$12 sps:$4 sm:$0xff]   ;;  %v813_v10 = vld [vmem:[%s1014_s1 + $0x78] ss:$12 sps:$4 sm:$0xff]  }
   0xf   : > { %500 = vmatprep.mubr.bf16.mxu0 %v860_v5  ;;  %469 = vmatpush1.bf16.msra.mxu0 %v805_v3  ;;  %v810_v8 = vld [vmem:[%s1014_s1 + $0x7c] ss:$12 sps:$4 sm:$0xff]   ;;  %v812_v9 = vld [vmem:[%s1014_s1 + $0x80] ss:$12 sps:$4 sm:$0xff]   ;;  %v814_v11 = vld [vmem:[%s1014_s1 + $0x64] ss:$12 sps:$4 sm:$0xff]  }
  0x10   : > { %757 = vmatprep.subr.bf16.mxu1 %v858_v1  ;;  %470 = vmatprep.subr.bf16.mxu0 %v806_v4  ;;  %v816_v12 = vld [vmem:[%s1014_s1 + $0x68] ss:$12 sps:$4 sm:$0xff]   ;;  %v817_v13 = vld [vmem:[%s1014_s1 + $0x60] ss:$12 sps:$4 sm:$0xff]   ;;  %v820_v15 = vld [vmem:[%s1014_s1 + $0x50] ss:$12 sps:$4 sm:$0xff]  }
  0x11   : > { %v818_v14 = vld [vmem:[%s1014_s1 + $0x4c] ss:$12 sps:$4 sm:$0xff]   ;;  %v821_v16 = vld [vmem:[%s1014_s1 + $0x48] ss:$12 sps:$4 sm:$0xff]   ;;  %v825_v19 = vld [vmem:[%s1014_s1 + $0x30] ss:$12 sps:$4 sm:$0xff]  }
  0x12   : > { %758 = vmatpush3.bf16.msra.mxu1 %v808_v6  ;;  %v822_v17 = vld [vmem:[%s1014_s1 + $0x34] ss:$12 sps:$4 sm:$0xff]   ;;  %v824_v18 = vld [vmem:[%s1014_s1 + $0x38] ss:$12 sps:$4 sm:$0xff]   ;;  %v826_v20 = vld [vmem:[%s1014_s1 + $0x1c] ss:$12 sps:$4 sm:$0xff]  }
  0x13   : > { %471 = vmatpush1.bf16.msra.mxu0 %v809_v7  ;;  %759 = vmatprep.subr.bf16.mxu1 %v858_v1  ;;  %s716_s14 = sshll.u32 %s1024_s18, 3  ;;  %v828_v21 = vld [vmem:[%s1014_s1 + $0x20] ss:$12 sps:$4 sm:$0xff]   ;;  %v829_v22 = vld [vmem:[%s1014_s1 + $0x18] ss:$12 sps:$4 sm:$0xff]   ;;  %v326_v29 = vshrl.u32 %v325_v28, 7 }
  0x14   : > { %472 = vmatprep.subr.bf16.mxu0 %v810_v8  ;;  %s266_s25 = scalar_lea.vmem %s1013_s0, %s716_s14  ;;  %v830_v23 = vld [vmem:[%s1014_s1 + $0x4] ss:$12 sps:$4 sm:$0xff]   ;;  %v832_v24 = vld [vmem:[%s1014_s1 + $0x8] ss:$12 sps:$4 sm:$0xff]   ;;  %v833_v26 = vld [vmem:[%s1014_s1] ss:$12 sps:$4 sm:$0xff]  }
  0x15   : > { %v289_v25 = vld [vmem:[%s266_s25] sm:$0xff]  ;;  %v335_v30 = vsub.s32 2, %v326_v29  ;;  %v327_v32 = vsub.s32 0, %v326_v29  ;;  %v331_v33 = vsub.s32 1, %v326_v29  ;;  %s717_s9 = sshll.u32 %s1024_s18, 2 }
  0x16   : > { %760 = vmatpush3.bf16.msra.mxu1 %v812_v9  ;;  %v290_v27 = vpack.c.bf16 %v289_v25, %v289_v25  ;;  %v323_v31 = vld [vmem:[%s1015_s2] sm:$0x7]  ;;  %s287_s12 = scalar_lea.vmem %s1018_s5, %s717_s9  ;;  %s273_s15 = scalar_lea.vmem %s1016_s3, %s717_s9 }
  0x17   : > { %473 = vmatpush1.bf16.msra.mxu0 %v813_v10  ;;  %761 = vmatprep.subr.bf16.mxu1 %v858_v1  ;;  %v336_v34 = vrot.slane %v323_v31, %v335_v30  ;;  %v328_v35 = vrot.slane %v323_v31, %v327_v32  ;;  %v332_v37 = vrot.slane %v323_v31, %v331_v33  ;;  %s280_s17 = scalar_lea.vmem %s1017_s4, %s717_s9 }
  0x18   : > { %474 = vmatprep.subr.bf16.mxu0 %v814_v11 }
  0x1a   : > { %762 = vmatpush3.bf16.msra.mxu1 %v816_v12 }
  0x1b   : > { %475 = vmatpush1.bf16.msra.mxu0 %v817_v13  ;;  %763 = vmatprep.subr.bf16.mxu1 %v858_v1 }
  0x1c   : > { %476 = vmatprep.subr.bf16.mxu0 %v818_v14 }
  0x1e   : > { %764 = vmatpush3.bf16.msra.mxu1 %v820_v15 }
  0x1f   : > { %477 = vmatpush1.bf16.msra.mxu0 %v821_v16  ;;  %765 = vmatprep.subr.bf16.mxu1 %v858_v1 }
  0x20   : > { %478 = vmatprep.subr.bf16.mxu0 %v822_v17 }
  0x22   : > { %766 = vmatpush3.bf16.msra.mxu1 %v824_v18 }
  0x23   : > { %479 = vmatpush1.bf16.msra.mxu0 %v825_v19  ;;  %767 = vmatprep.subr.bf16.mxu1 %v858_v1 }
  0x24   : > { %480 = vmatprep.subr.bf16.mxu0 %v826_v20 }
  0x26   : > { %768 = vmatpush3.bf16.msra.mxu1 %v828_v21 }
  0x27   : > { %481 = vmatpush1.bf16.msra.mxu0 %v829_v22  ;;  %769 = vmatprep.subr.bf16.mxu1 %v858_v1 }
  0x28   : > { %482 = vmatprep.subr.bf16.mxu0 %v830_v23 }
  0x2a   : > { %770 = vmatpush3.bf16.msra.mxu1 %v832_v24 }
  0x2b   : > { %483 = vmatpush1.bf16.msra.mxu0 %v833_v26 }
  0x2d   : > { %772 = vmatmul.mubr.bf16.vlgmr.msra.gmra.mxu1 %v290_v27 }
  0x2e   : > { %501 = vmatmul.mubr.bf16.vlgmr.msra.gmra.mxu0 %v290_v27 }
  0xed   : > { %v543_v36 = vpop.f32.mrf.mxu1 }
  0xee   : > { %v544_v38 = vadd.f32 %v543_v36, %v336_v34  ;;  %v502_v39 = vpop.f32.mrf.mxu0 }
  0xef   : > { %v503_v40 = vadd.f32 %v502_v39, %v328_v35  ;;  %v773_v41 = vpop.f32.mrf.mxu1 }
  0xf0   : > { %v553_v42 = vpack.c.bf16 %v544_v38, %v544_v38  ;;  %v504_v43 = vpop.f32.mrf.mxu0 }
  0xf1   : > { %v549_v44 = vpack.c.bf16 %v503_v40, %v503_v40  ;;  %v505_v45 = vadd.f32 %v504_v43, %v332_v37  ;;  %v546_v46 = vpop.f32.mrf.mxu1 }
  0xf2   : > { %554 = vst [vmem:[%s287_s12] sm:$0xf] %v553_v42  ;;  %v506_v47 = vpop.f32.mrf.mxu0 }
  0xf3   : > { %550 = vst [vmem:[%s273_s15] sm:$0xf] %v549_v44  ;;  %v551_v48 = vpack.c.bf16 %v505_v45, %v505_v45  ;;  %v774_v49 = vpop.f32.mrf.mxu1 }
  0xf4   : > { %v507_v50 = vpop.f32.mrf.mxu0 }
  0xf5   : > { %552 = vst [vmem:[%s280_s17] sm:$0xf] %v551_v48 }
  0xf6 PF: > { %s16_s20 = sadd.s32 1, %s856_s20   ;;  %s1019_s18 = smov %s852_s19 }
  0xf7   : > { %p13_p5 = scmp.ge.s32.totalorder %s16_s20, 4   ;;  %s1020_s19 = smov %s1022_s21 }
  0xf9   :  { %15 = sbr.rel (!%p13_p5) target bundleno = 2 (0x2), region = 86 }

// kernel: encoder_forward.5
= control target key start
LH: loop header
LB: loop body
LE: loop exit
PB: predicated region body
PF: predicated region fallthrough
CT: control target
= control target key end

     0   :  { %s2086_s18 = smov 0   ;;  %s2088_s19 = smov 0   ;;  %s2349_s0 = inlined_call_operand.vmem [shape: f32[2,8,128], index: 0, kind: input, shape index: {}]   ;;  %s2350_s1 = inlined_call_operand.vmem [shape: s32[2,1,8], index: 1, kind: input, shape index: {}]   ;;  %s2351_s2 = inlined_call_operand.vmem [shape: bf16[2,4,8,32], index: 2, kind: input, shape index: {}]   ;;  %s2352_s3 = inlined_call_operand.vmem [shape: bf16[2,4,8,32], index: 3, kind: input, shape index: {}]   ;;  %s2353_s4 = inlined_call_operand.vmem [shape: bf16[2,4,8,32], index: 4, kind: input, shape index: {}]   ;;  %s2354_s5 = inlined_call_operand.vmem [shape: bf16[128,128], index: 5, kind: input, shape index: {}]   ;;  %s2355_s6 = inlined_call_operand.vmem [shape: f32[1,128], index: 6, kind: input, shape index: {}]   ;;  %s2356_s7 = inlined_call_operand.vmem [shape: f32[1,128], index: 7, kind: input, shape index: {}]   ;;  %s2357_s8 = inlined_call_operand.vmem [shape: f32[1,128], index: 8, kind: input, shape index: {}]   ;;  %s2358_s9 = inlined_call_operand.vmem [shape: bf16[128,256], index: 9, kind: input, shape index: {}]   ;;  %s2359_s10 = inlined_call_operand.vmem [shape: f32[1,256], index: 10, kind: input, shape index: {}]   ;;  %s2360_s11 = inlined_call_operand.vmem [shape: bf16[256,128], index: 11, kind: input, shape index: {}]   ;;  %s2361_s12 = inlined_call_operand.vmem [shape: f32[1,128], index: 12, kind: input, shape index: {}]   ;;  %s2362_s13 = inlined_call_operand.vmem [shape: f32[1,128], index: 13, kind: input, shape index: {}]   ;;  %s2363_s14 = inlined_call_operand.vmem [shape: f32[1,128], index: 14, kind: input, shape index: {}]   ;;  %s2364_s15 = inlined_call_operand.vmem [shape: f32[2,8,128], index: 15, kind: output, shape index: {}]  }
   0x1   :  { %s2090_s20 = smov 0  }
   0x2 LB: > { %s37_s21 = sadd.s32 1, %s1993_s19  ;;  %p1693_p0 = scmp.ge.s32.totalorder %s1997_s20, 1  ;;  %s1997_s20 = sphi %s2090_s20, %s25_s20   ;;  %s1993_s19 = sphi %s2088_s19, %s2366_s19   ;;  %s1989_s18 = sphi %s2086_s18, %s2365_s18  }
   0x3   : > { %p39_p1 = scmp.ge.s32.totalorder %s37_s21, 2  ;;  %p498_p2 = scmp.lt.s32.totalorder %s1997_s20, 3 }
   0x5   : > { %s2368_s21 = smov (%p39_p1, %s37_s21), 0  ;;  %p499_p3 = pnand %p1693_p0, %p498_p2 }
   0x6   : > { %p571_p4 = scmp.lt.s32.totalorder (!%p499_p3), %s1989_s18, 1  ;;  %s2002_s27 = smov (!%p499_p3), 32  }
   0x7   : > { %502 = sbr.rel (%p499_p3) target bundleno = 2083 (0x823), region = 80  ;;  %s2003_s30 = smov (!%p499_p3), 64  }
   0xc   : > { %v1999_v0 = vmov 0.0   ;;  %vm2000_vm0 = vmmov 0   ;;  %s2370_s18 = smov (!%p571_p4, %s1989_s18), 1  ;;  %vm629_vm1 = vcmask 261120   ;;  %v624_v13 = vlaneseq }
   0xd   : > { %1808 = vmatprep.subr.bf16.mxu1 %v1999_v0  ;;  %1810 = vmatprep.mubr.msk.bf16.mxu1 %vm2000_vm0, %v1999_v0  ;;  %s2113_s22 = sshll.u32 %s2370_s18, 4  ;;  %s580_s16 = scalar_lea.vmem %s2350_s1, %s2370_s18  ;;  %v2001_v17 = vmov -1e+10   ;;  %vm814_vm3 = vcmask 64512   ;;  %vm866_vm4 = vcmask 1043456   ;;  %vm1061_vm5 = vcmask 523264  }
   0xe   : > { %1832 = vmatprep.subr.bf16.mxu0 %v1999_v0  ;;  %1834 = vmatprep.mubr.msk.bf16.mxu0 %vm2000_vm0, %v1999_v0  ;;  %s593_s25 = scalar_lea.vmem %s2352_s3, %s2113_s22  ;;  %s588_s28 = scalar_lea.vmem %s2351_s2, %s2113_s22  ;;  %v620_v14 = vld [vmem:[%s580_s16] sm:$0x1]  ;;  %v2147_v15 = vshrl.u32 %v624_v13, 7  ;;  %vm1063_vm6 = vcmask 785408  }
   0xf   : > { %v612_v1 = vld [vmem:[%s593_s25] sm:$0xf]  ;;  %v613_v3 = vld [vmem:[%s593_s25 + $0x4] sm:$0xf]  ;;  %v614_v5 = vld [vmem:[%s593_s25 + $0x8] sm:$0xf]  ;;  %s598_s24 = scalar_lea.vmem %s2353_s4, %s2113_s22 }
  0x10   : > { %v634_v2 = vsel %vm629_vm1, %v612_v1, 0  ;;  %v608_v4 = vld [vmem:[%s588_s28] sm:$0xf]  ;;  %v680_v6 = vsel %vm629_vm1, %v613_v3, 0  ;;  %v726_v7 = vsel %vm629_vm1, %v614_v5, 0  ;;  %vm621_vm2 = vcmp.ne.s32.totalorder %v620_v14, 0 }
  0x11   : > { %1809 = vmatpush3.bf16.xpose.msra.mxu1 %v634_v2  ;;  %v609_v8 = vld [vmem:[%s588_s28 + $0x4] sm:$0xf]  ;;  %v615_v9 = vld [vmem:[%s593_s25 + $0xc] sm:$0xf]  ;;  %v610_v10 = vld [vmem:[%s588_s28 + $0x8] sm:$0xf] }
  0x12   : > { %1814 = vmatprep.subr.bf16.mxu1 %v1999_v0  ;;  %v772_v11 = vsel %vm629_vm1, %v615_v9, 0  ;;  %v611_v12 = vld [vmem:[%s588_s28 + $0xc] sm:$0xf]  ;;  %v626_v16 = vsub.s32 0, %v2147_v15  ;;  %v622_v18 = vsel %vm621_vm2, 0.0, %v2001_v17  ;;  %s2004_s16 = smov 96  }
  0x13   : > { %v616_v62 = vld [vmem:[%s598_s24] sm:$0xf]  ;;  %v617_v3 = vld [vmem:[%s598_s24 + $0x4] sm:$0xf]  ;;  %v618_v5 = vld [vmem:[%s598_s24 + $0x8] sm:$0xf] }
  0x14   : > { %v627_v19 = vrot.slane %v622_v18, %v626_v16  ;;  %v868_v63 = vsel %vm866_vm4, %v616_v62, 0  ;;  %s1694_s17 = sshll.u32 %s2370_s18, 3 }
  0x15   : > { %1833 = vmatpush3.bf16.msra.mxu0 %v868_v63  ;;  %s577_s22 = scalar_lea.vmem %s2349_s0, %s1694_s17  ;;  %s605_s25 = scalar_lea.vmem %s2364_s15, %s1694_s17 }
  0x16   : > { %1844 = vmatprep.subr.bf16.mxu0 %v1999_v0 }
  0x18   : > { %1811 = vmatmul.mubr.msk.bf16.vlgmr.msra.gmra.mxu1 %vm629_vm1, %v608_v4  ;;  %v914_v4 = vsel %vm866_vm4, %v617_v3, 0  ;;  %v1917_v3 = vld [vmem:[%s2358_s9 + $0x74] ss:$8 sps:$4 sm:$0xff]  }
  0x19   : > { %1815 = vmatpush3.bf16.xpose.msra.mxu1 %v680_v6  ;;  %1816 = vmatprep.mubr.msk.bf16.mxu1 %vm2000_vm0, %v1999_v0  ;;  %v960_v6 = vsel %vm866_vm4, %v618_v5, 0  ;;  %v1918_v5 = vld [vmem:[%s2358_s9 + $0x60] ss:$8 sps:$4 sm:$0xff]  }
  0x1a   : > { %1820 = vmatprep.subr.bf16.mxu1 %v1999_v0 }
  0x20   : > { %1817 = vmatmul.mubr.msk.bf16.vlgmr.msra.gmra.mxu1 %vm629_vm1, %v609_v8 }
  0x21   : > { %1821 = vmatpush3.bf16.xpose.msra.mxu1 %v726_v7  ;;  %1822 = vmatprep.mubr.msk.bf16.mxu1 %vm2000_vm0, %v1999_v0  ;;  %v619_v7 = vld [vmem:[%s598_s24 + $0xc] sm:$0xf] }
  0x22   : > { %1826 = vmatprep.subr.bf16.mxu1 %v1999_v0  ;;  %v1006_v8 = vsel %vm866_vm4, %v619_v7, 0 }
  0x28   : > { %1823 = vmatmul.mubr.msk.bf16.vlgmr.msra.gmra.mxu1 %vm629_vm1, %v610_v10 }
  0x29   : > { %1827 = vmatpush3.bf16.xpose.msra.mxu1 %v772_v11  ;;  %1828 = vmatprep.mubr.msk.bf16.mxu1 %vm2000_vm0, %v1999_v0 }
  0x2a   : > { %1838 = vmatprep.subr.bf16.mxu1 %v1999_v0 }
  0x30   : > { %1829 = vmatmul.mubr.msk.bf16.vlgmr.msra.gmra.mxu1 %vm629_vm1, %v611_v12 }
  0x31   : > { %1840 = vmatprep.mubr.msk.bf16.mxu1 %vm2000_vm0, %v1999_v0  ;;  %1839 = vmatpush3.bf16.msra.mxu1 %v914_v4  ;;  %v1920_v4 = vld [vmem:[%s2358_s9 + $0x64] ss:$8 sps:$4 sm:$0xff]  }
  0x32   : > { %1850 = vmatprep.subr.bf16.mxu1 %v1999_v0 }
  0xd8   : > { %v670_v20 = vpop.f32.mrf.mxu1 }
  0xd9   : > { %v671_v21 = vadd.f32 %v670_v20, %v627_v19 }
  0xda   : > { %v1812_v22 = vpop.f32.mrf.mxu1 }
  0xdb   : > { %v815_v23 = vsel %vm814_vm3, %v671_v21, -inf }
  0xdc   : > { %v673_v24 = vpop.f32.mrf.mxu1  ;;  %816 = vmax.xlane.f32.xlu0 %v815_v23 }
  0xde   : > { %v1813_v25 = vpop.f32.mrf.mxu1 }
  0xe0   : > { %v716_v26 = vpop.f32.mrf.mxu1 }
  0xe1   : > { %v717_v27 = vadd.f32 %v716_v26, %v627_v19 }
  0xe2   : > { %v1818_v28 = vpop.f32.mrf.mxu1 }
  0xe3   : > { %v818_v29 = vsel %vm814_vm3, %v717_v27, -inf  ;;  %v1908_v28 = vld [vmem:[%s2354_s5 + $0x30] sm:$0xff]  }
  0xe4   : > { %v719_v30 = vpop.f32.mrf.mxu1  ;;  %819 = vmax.xlane.f32.xlu0 %v818_v29  ;;  %v1909_v29 = vld [vmem:[%s2354_s5 + $0x28] sm:$0xff]  }
  0xe5   : > { %v1910_v30 = vld [vmem:[%s2354_s5 + $0x20] sm:$0xff]  }
  0xe6   : > { %v1819_v31 = vpop.f32.mrf.mxu1 }
  0xe7   : > { %v1911_v31 = vld [vmem:[%s2354_s5 + $0x18] sm:$0xff]  }
  0xe8   : > { %v762_v32 = vpop.f32.mrf.mxu1 }
  0xe9   : > { %v763_v33 = vadd.f32 %v762_v32, %v627_v19 }
  0xea   : > { %v1824_v34 = vpop.f32.mrf.mxu1 }
  0xeb   : > { %v821_v35 = vsel %vm814_vm3, %v763_v33, -inf  ;;  %v1912_v34 = vld [vmem:[%s2354_s5 + $0x10] sm:$0xff]  }
  0xec   : > { %v765_v36 = vpop.f32.mrf.mxu1  ;;  %822 = vmax.xlane.f32.xlu1 %v821_v35 }
  0xed   : > { %v1913_v36 = vld [vmem:[%s2354_s5 + $0x8] sm:$0xff]  }
  0xee   : > { %v1825_v37 = vpop.f32.mrf.mxu1 }
  0xf0   : > { %v808_v38 = vpop.f32.mrf.mxu1 }
  0xf1   : > { %v809_v39 = vadd.f32 %v808_v38, %v627_v19 }
  0xf2   : > { %v1830_v40 = vpop.f32.mrf.mxu1 }
  0xf3   : > { %v824_v41 = vsel %vm814_vm3, %v809_v39, -inf  ;;  %v1914_v40 = vld [vmem:[%s2354_s5] sm:$0xff]  }
  0xf4   : > { %v811_v42 = vpop.f32.mrf.mxu1  ;;  %825 = vmax.xlane.f32.xlu1 %v824_v41 }
  0xf6   : > { %v1831_v43 = vpop.f32.mrf.mxu1 }
 0x165   : > { %v817_v44 = vpop.xlane.xlu0 %816 }
 0x166   : > { %v827_v45 = vsub.f32 %v671_v21, %v817_v44 }
 0x168   : > { %v831_v46 = vmul.f32 1.442695, %v827_v45 }
 0x16a   : > { %1955 = vpow2.f32 %v831_v46 }
 0x16d   : > { %v820_v47 = vpop.xlane.xlu0 %819 }
 0x16e   : > { %v828_v48 = vsub.f32 %v717_v27, %v820_v47  ;;  %v1907_v27 = vld [vmem:[%s2354_s5 + $0x38] sm:$0xff]  }
 0x170   : > { %v833_v49 = vmul.f32 1.442695, %v828_v48 }
 0x172   : > { %1957 = vpow2.f32 %v833_v49 }
 0x175   : > { %v823_v50 = vpop.xlane.xlu1 %822 }
 0x176   : > { %v829_v51 = vsub.f32 %v763_v33, %v823_v50 }
 0x177   : > { %v1956_v52 = vpop.eup %1955 }
 0x178   : > { %v835_v53 = vmul.f32 1.442695, %v829_v51  ;;  %v839_v54 = vsel %vm814_vm3, %v1956_v52, 0.0 }
 0x179   : > { %840 = vadd.xlane.f32.xlu0 %v839_v54 }
 0x17a   : > { %1959 = vpow2.f32 %v835_v53 }
 0x17d   : > { %v826_v55 = vpop.xlane.xlu1 %825 }
 0x17e   : > { %v830_v56 = vsub.f32 %v809_v39, %v826_v55 }
 0x17f   : > { %v1958_v57 = vpop.eup %1957 }
 0x180   : > { %v837_v58 = vmul.f32 1.442695, %v830_v56  ;;  %v842_v59 = vsel %vm814_vm3, %v1958_v57, 0.0 }
 0x181   : > { %843 = vadd.xlane.f32.xlu1 %v842_v59  ;;  %v607_v59 = vld [vmem:[%s577_s22] sm:$0xff] }
 0x182   : > { %1961 = vpow2.f32 %v837_v58 }
 0x187   : > { %v1960_v60 = vpop.eup %1959 }
 0x188   : > { %v845_v61 = vsel %vm814_vm3, %v1960_v60, 0.0 }
 0x189   : > { %846 = vadd.xlane.f32.xlu0 %v845_v61 }
 0x18f   : > { %v1962_v1 = vpop.eup %1961 }
 0x190   : > { %v848_v2 = vsel %vm814_vm3, %v1962_v1, 0.0 }
 0x191   : > { %849 = vadd.xlane.f32.xlu1 %v848_v2  ;;  %v1915_v2 = vld [vmem:[%s2358_s9 + $0x70] ss:$8 sps:$4 sm:$0xff]  }
 0x202   : > { %v841_v9 = vpop.xlane.xlu0 %840 }
 0x203   : > { %1963 = vrcp.f32 %v841_v9 }
 0x20a   : > { %v844_v10 = vpop.xlane.xlu1 %843 }
 0x20b   : > { %1965 = vrcp.f32 %v844_v10  ;;  %v1923_v10 = vld [vmem:[%s2358_s9 + $0x54] ss:$8 sps:$4 sm:$0xff]  }
 0x210   : > { %v1964_v11 = vpop.eup %1963 }
 0x211   : > { %v855_v12 = vmul.f32 %v1964_v11, %v1956_v52  ;;  %v1921_v11 = vld [vmem:[%s2358_s9 + $0x50] ss:$8 sps:$4 sm:$0xff]  }
 0x212   : > { %v847_v13 = vpop.xlane.xlu0 %846 }
 0x213   : > { %1967 = vrcp.f32 %v847_v13  ;;  %v859_v14 = vpack.c.bf16 %v855_v12, %v855_v12  ;;  %v1924_v12 = vld [vmem:[%s2358_s9 + $0x40] ss:$8 sps:$4 sm:$0xff]   ;;  %v1926_v13 = vld [vmem:[%s2358_s9 + $0x44] ss:$8 sps:$4 sm:$0xff]  }
 0x215   : > { %1835 = vmatmul.mubr.msk.bf16.vlgmr.msra.gmra.mxu0 %vm814_vm3, %v859_v14  ;;  %v1929_v14 = vld [vmem:[%s2358_s9 + $0x34] ss:$8 sps:$4 sm:$0xff]  }
 0x216   : > { %1845 = vmatpush3.bf16.msra.mxu0 %v960_v6  ;;  %1846 = vmatprep.mubr.msk.bf16.mxu0 %vm2000_vm0, %v1999_v0 }
 0x217   : > { %1856 = vmatprep.subr.bf16.mxu0 %v1999_v0 }
 0x218   : > { %v1966_v17 = vpop.eup %1965 }
 0x219   : > { %v856_v18 = vmul.f32 %v1966_v17, %v1958_v57  ;;  %v1710_v57 = vld [vmem:[%s2355_s6] ss:$0 sm:$0xff]  ;;  %v1927_v17 = vld [vmem:[%s2358_s9 + $0x30] ss:$8 sps:$4 sm:$0xff]  }
 0x21a   : > { %v850_v19 = vpop.xlane.xlu1 %849 }
 0x21b   : > { %1969 = vrcp.f32 %v850_v19  ;;  %v860_v20 = vpack.c.bf16 %v856_v18, %v856_v18  ;;  %v1932_v18 = vld [vmem:[%s2358_s9 + $0x24] ss:$8 sps:$4 sm:$0xff]   ;;  %v2005_v19 = vmov 0  }
 0x21d   : > { %1841 = vmatmul.mubr.msk.bf16.vlgmr.msra.gmra.mxu1 %vm814_vm3, %v860_v20  ;;  %v1930_v20 = vld [vmem:[%s2358_s9 + $0x20] ss:$8 sps:$4 sm:$0xff]  }
 0x21e   : > { %1851 = vmatpush3.bf16.msra.mxu1 %v1006_v8  ;;  %1852 = vmatprep.mubr.msk.bf16.mxu1 %vm2000_vm0, %v1999_v0 }
 0x21f   : > { %1315 = vmatprep.subr.bf16.mxu1 %v1917_v3 }
 0x220   : > { %v1968_v21 = vpop.eup %1967 }
 0x221   : > { %v857_v22 = vmul.f32 %v1968_v21, %v1960_v60  ;;  %v1935_v21 = vld [vmem:[%s2358_s9 + $0x14] ss:$8 sps:$4 sm:$0xff]  }
 0x223   : > { %v861_v23 = vpack.c.bf16 %v857_v22, %v857_v22  ;;  %v1933_v22 = vld [vmem:[%s2358_s9 + $0x10] ss:$8 sps:$4 sm:$0xff]  }
 0x225   : > { %1847 = vmatmul.mubr.msk.bf16.vlgmr.msra.gmra.mxu0 %vm814_vm3, %v861_v23  ;;  %v1938_v23 = vld [vmem:[%s2358_s9 + $0x4] ss:$8 sps:$4 sm:$0xff]  }
 0x226   : > { %1872 = vmatprep.mubr.msk.bf16.mxu0 %vm2000_vm0, %v1999_v0  ;;  %1857 = vmatpush3.bf16.msra.mxu0 %v1907_v27  ;;  %v1941_v27 = vld [vmem:[%s2360_s11 + $0x70] sm:$0xff]  }
 0x227   : > { %1858 = vmatprep.subr.bf16.mxu0 %v1999_v0 }
 0x228   : > { %v1970_v24 = vpop.eup %1969 }
 0x229   : > { %v858_v25 = vmul.f32 %v1970_v24, %v1962_v1  ;;  %v1936_v24 = vld [vmem:[%s2358_s9] ss:$8 sps:$4 sm:$0xff]  }
 0x22a   : > { %1859 = vmatpush3.bf16.msra.mxu0 %v1908_v28  ;;  %v1942_v28 = vld [vmem:[%s2360_s11 + $0x30] sm:$0xff]  }
 0x22b   : > { %v862_v26 = vpack.c.bf16 %v858_v25, %v858_v25  ;;  %1860 = vmatprep.subr.bf16.mxu0 %v1999_v0  ;;  %v1939_v25 = vld [vmem:[%s2360_s11 + $0x78] sm:$0xff]  }
 0x22d   : > { %1853 = vmatmul.mubr.msk.bf16.vlgmr.msra.gmra.mxu1 %vm814_vm3, %v862_v26  ;;  %v1940_v26 = vld [vmem:[%s2360_s11 + $0x38] sm:$0xff]  }
 0x22e   : > { %1861 = vmatpush3.bf16.msra.mxu0 %v1909_v29  ;;  %1316 = vmatpush1.bf16.msra.mxu1 %v1915_v2  ;;  %v1943_v29 = vld [vmem:[%s2360_s11 + $0x68] sm:$0xff]   ;;  %v1737_v2 = vld [vmem:[%s2361_s12] ss:$0 sm:$0xff] }
 0x22f   : > { %1862 = vmatprep.subr.bf16.mxu0 %v1999_v0  ;;  %1317 = vmatprep.subr.bf16.mxu1 %v1920_v4 }
 0x230   : > { %1347 = vmatprep.mubr.bf16.mxu1 %v2005_v19  ;;  %v1755_v19 = vld [vmem:[%s2363_s14] ss:$0 sm:$0xff] }
 0x232   : > { %1863 = vmatpush3.bf16.msra.mxu0 %v1910_v30  ;;  %1318 = vmatpush1.bf16.msra.mxu1 %v1918_v5  ;;  %v1944_v30 = vld [vmem:[%s2360_s11 + $0x28] sm:$0xff]  }
 0x233   : > { %1864 = vmatprep.subr.bf16.mxu0 %v1999_v0  ;;  %1319 = vmatprep.subr.bf16.mxu1 %v1923_v10 }
 0x236   : > { %1865 = vmatpush3.bf16.msra.mxu0 %v1911_v31  ;;  %1320 = vmatpush1.bf16.msra.mxu1 %v1921_v11  ;;  %v1945_v31 = vld [vmem:[%s2360_s11 + $0x60] sm:$0xff]  }
 0x237   : > { %1866 = vmatprep.subr.bf16.mxu0 %v1999_v0  ;;  %1321 = vmatprep.subr.bf16.mxu1 %v1926_v13 }
 0x23a   : > { %1867 = vmatpush3.bf16.msra.mxu0 %v1912_v34  ;;  %1322 = vmatpush1.bf16.msra.mxu1 %v1924_v12  ;;  %v1948_v34 = vld [vmem:[%s2360_s11 + $0x18] sm:$0xff]  }
 0x23b   : > { %1868 = vmatprep.subr.bf16.mxu0 %v1999_v0  ;;  %1323 = vmatprep.subr.bf16.mxu1 %v1929_v14 }
 0x23e   : > { %1869 = vmatpush3.bf16.msra.mxu0 %v1913_v36  ;;  %1324 = vmatpush1.bf16.msra.mxu1 %v1927_v17  ;;  %v1950_v36 = vld [vmem:[%s2360_s11 + $0x10] sm:$0xff]   ;;  %v1754_v17 = vld [vmem:[%s2362_s13] ss:$0 sm:$0xff] }
 0x23f   : > { %1870 = vmatprep.subr.bf16.mxu0 %v1999_v0  ;;  %1325 = vmatprep.subr.bf16.mxu1 %v1932_v18 }
 0x242   : > { %1871 = vmatpush3.bf16.msra.mxu0 %v1914_v40  ;;  %1326 = vmatpush1.bf16.msra.mxu1 %v1930_v20 }
 0x243   : > { %1327 = vmatprep.subr.bf16.mxu1 %v1935_v21  ;;  %1786 = vmatprep.subr.bf16.mxu0 %v1939_v25 }
 0x246   : > { %1328 = vmatpush1.bf16.msra.mxu1 %v1933_v22 }
 0x247   : > { %1329 = vmatprep.subr.bf16.mxu1 %v1938_v23 }
 0x24a   : > { %1330 = vmatpush1.bf16.msra.mxu1 %v1936_v24 }
 0x2d5   : > { %v904_v32 = vpop.f32.mrf.mxu0 }
 0x2d7   : > { %v1836_v33 = vpop.f32.mrf.mxu0 }
 0x2d8   : > { %v1947_v33 = vld [vmem:[%s2360_s11 + $0x58] sm:$0xff]  }
 0x2d9   : > { %v907_v35 = vpop.f32.mrf.mxu0 }
 0x2da   : > { %v1949_v35 = vld [vmem:[%s2360_s11 + $0x50] sm:$0xff]  }
 0x2db   : > { %v1837_v37 = vpop.f32.mrf.mxu0 }
 0x2dd   : > { %v950_v38 = vpop.f32.mrf.mxu1 }
 0x2de   : > { %1049 = vrot.lane.b32.xlu0 %v950_v38, %s2002_s27 }
 0x2df   : > { %v1842_v39 = vpop.f32.mrf.mxu1 }
 0x2e1   : > { %v953_v41 = vpop.f32.mrf.mxu1 }
 0x2e2   : > { %v1719_v41 = vld [vmem:[%s2356_s7] ss:$0 sm:$0xff] }
 0x2e3   : > { %v1843_v42 = vpop.f32.mrf.mxu1 }
 0x2e5   : > { %v996_v43 = vpop.f32.mrf.mxu0 }
 0x2e6   : > { %1053 = vrot.lane.b32.xlu1 %v996_v43, %s2003_s30  ;;  %v1720_v43 = vld [vmem:[%s2357_s8] ss:$0 sm:$0xff] }
 0x2e7   : > { %v1848_v44 = vpop.f32.mrf.mxu0 }
 0x2e9   : > { %v999_v45 = vpop.f32.mrf.mxu0 }
 0x2eb   : > { %v1849_v46 = vpop.f32.mrf.mxu0 }
 0x2ed   : > { %v1042_v47 = vpop.f32.mrf.mxu1 }
 0x2ee   : > { %1057 = vrot.lane.b32.xlu1 %v1042_v47, %s2004_s16  ;;  %v1951_v47 = vld [vmem:[%s2360_s11 + $0x48] sm:$0xff]  }
 0x2ef   : > { %v1854_v0 = vpop.f32.mrf.mxu1 }
 0x2f0   : > { %v1952_v0 = vld [vmem:[%s2360_s11 + $0x8] sm:$0xff]  }
 0x2f1   : > { %v1045_v48 = vpop.f32.mrf.mxu1 }
 0x2f2   : > { %v1953_v48 = vld [vmem:[%s2360_s11 + $0x40] sm:$0xff]  }
 0x2f3   : > { %v1855_v49 = vpop.f32.mrf.mxu1 }
 0x2f4   : > { %v1954_v49 = vld [vmem:[%s2360_s11] sm:$0xff]  }
 0x350   : > { %v1050_v50 = vpop.permute.xlu0 %1049 }
 0x351   : > { %v1060_v52 = vsel %vm629_vm1, %v904_v32, %v1050_v50  ;;  %v1946_v32 = vld [vmem:[%s2360_s11 + $0x20] sm:$0xff]  }
 0x352   : > { %v1223_v50 = vld [vmem:[%s2359_s10] sm:$0x3] }
 0x358   : > { %v1054_v51 = vpop.permute.xlu1 %1053 }
 0x359   : > { %v1062_v53 = vsel %vm1061_vm5, %v1060_v52, %v1054_v51  ;;  %v1231_v51 = vsub.s32 1, %v2147_v15  ;;  %v1228_v52 = vrot.slane %v1223_v50, %v626_v16 }
 0x360   : > { %v1058_v54 = vpop.permute.xlu1 %1057 }
 0x361   : > { %v1064_v55 = vsel %vm1063_vm6, %v1062_v53, %v1058_v54  ;;  %v1232_v53 = vrot.slane %v1223_v50, %v1231_v51 }
 0x362   : > { %v1065_v56 = vpack.c.bf16 %v1064_v55, %v1064_v55 }
 0x364   : > { %1873 = vmatmul.mubr.bf16.vlgmr.msra.gmra.mxu0 %v1065_v56 }
 0x365   : > { %1787 = vmatpush3.bf16.msra.mxu0 %v1940_v26 }
 0x366   : > { %1788 = vmatprep.subr.bf16.mxu0 %v1941_v27 }
 0x369   : > { %1789 = vmatpush3.bf16.msra.mxu0 %v1942_v28 }
 0x36a   : > { %1790 = vmatprep.subr.bf16.mxu0 %v1943_v29 }
 0x36d   : > { %1791 = vmatpush3.bf16.msra.mxu0 %v1944_v30 }
 0x36e   : > { %1792 = vmatprep.subr.bf16.mxu0 %v1945_v31 }
 0x371   : > { %1793 = vmatpush3.bf16.msra.mxu0 %v1946_v32 }
 0x372   : > { %1794 = vmatprep.subr.bf16.mxu0 %v1947_v33 }
 0x375   : > { %1795 = vmatpush3.bf16.msra.mxu0 %v1948_v34 }
 0x376   : > { %1796 = vmatprep.subr.bf16.mxu0 %v1949_v35 }
 0x379   : > { %1797 = vmatpush3.bf16.msra.mxu0 %v1950_v36 }
 0x37a   : > { %1798 = vmatprep.subr.bf16.mxu0 %v1951_v47 }
 0x37d   : > { %1799 = vmatpush3.bf16.msra.mxu0 %v1952_v0 }
 0x37e   : > { %1800 = vmatprep.subr.bf16.mxu0 %v1953_v48 }
 0x381   : > { %1801 = vmatpush3.bf16.msra.mxu0 %v1954_v49 }
 0x424   : > { %v1171_v58 = vpop.f32.mrf.mxu0 }
 0x425   : > { %v1172_v60 = vadd.f32 %v1710_v57, %v1171_v58 }
 0x426   : > { %v1874_v61 = vpop.f32.mrf.mxu0 }
 0x427   : > { %v1177_v62 = vadd.f32 %v1172_v60, %v607_v59 }
 0x428   : > { %v1174_v63 = vpop.f32.mrf.mxu0 }
 0x429   : > { %1180 = vadd.xlane.f32.xlu1 %v1177_v62 }
 0x42a   : > { %v1875_v1 = vpop.f32.mrf.mxu0 }
 0x4b2   : > { %v1181_v6 = vpop.xlane.xlu1 %1180 }
 0x4b3   : > { %v1183_v7 = vmul.f32 0.0078125, %v1181_v6 }
 0x4b5   : > { %v1184_v8 = vsub.f32 %v1177_v62, %v1183_v7 }
 0x4b7   : > { %v1185_v9 = vmul.f32 %v1184_v8, %v1184_v8 }
 0x4b9   : > { %1186 = vadd.xlane.f32.xlu0 %v1185_v9 }
 0x542   : > { %v1187_v37 = vpop.xlane.xlu0 %1186 }
 0x543   : > { %v1188_v38 = vmul.f32 0.0078125, %v1187_v37 }
 0x545   : > { %v1189_v39 = vadd.f32 1e-05, %v1188_v38 }
 0x547   : > { %1971 = vrsqrt.f32 %v1189_v39 }
 0x554   : > { %v1972_v40 = vpop.eup %1971 }
 0x555   : > { %v1191_v42 = vmul.f32 %v1972_v40, %v1184_v8 }
 0x557   : > { %v1198_v44 = vmul.f32 %v1719_v41, %v1191_v42 }
 0x559   : > { %v1205_v45 = vadd.f32 %v1720_v43, %v1198_v44 }
 0x55b   : > { %v1206_v46 = vpack.c.bf16 %v1205_v45, %v1205_v45 }
 0x55d   : > { %1348 = vmatmul.mubr.bf16.vlgmr.msra.gmra.mxu1 %v1206_v46 }
 0x61d   : > { %v1349_v54 = vpop.f32.mrf.mxu1 }
 0x61e   : > { %v1350_v55 = vadd.f32 %v1349_v54, %v1228_v52 }
 0x61f   : > { %v1351_v56 = vpop.f32.mrf.mxu1 }
 0x620   : > { %v1352_v57 = vadd.f32 %v1351_v56, %v1232_v53  ;;  %v1356_v58 = vmax.f32 %v1350_v55, 0.0 }
 0x621   : > { %v1353_v59 = vpop.f32.mrf.mxu1 }
 0x622   : > { %v1357_v60 = vmax.f32 %v1352_v57, 0.0  ;;  %v1358_v63 = vpack.c.bf16 %v1356_v58, %v1356_v58 }
 0x623   : > { %v1354_v61 = vpop.f32.mrf.mxu1 }
 0x624   : > { %v1359_v62 = vpack.c.bf16 %v1357_v60, %v1357_v60 }
 0x626   : > { %1527 = vmatprep.mubr.bf16.mxu0 %v1359_v62 }
 0x627   : > { %1528 = vmatmul.mubr.bf16.vlgmr.msra.gmra.mxu0 %v1358_v63 }
 0x6e7   : > { %v1802_v1 = vpop.f32.mrf.mxu0 }
 0x6e9   : > { %v1803_v15 = vpop.f32.mrf.mxu0 }
 0x6ea   : > { %v1804_v16 = vadd.f32 %v1803_v15, %v1802_v1 }
 0x6eb   : > { %v1805_v3 = vpop.f32.mrf.mxu0 }
 0x6ec   : > { %v1530_v4 = vadd.f32 %v1804_v16, %v1737_v2 }
 0x6ed   : > { %v1806_v5 = vpop.f32.mrf.mxu0 }
 0x6ee   : > { %v1535_v6 = vadd.f32 %v1530_v4, %v1205_v45 }
 0x6f0   : > { %1538 = vadd.xlane.f32.xlu0 %v1535_v6 }
 0x779   : > { %v1539_v7 = vpop.xlane.xlu0 %1538 }
 0x77a   : > { %v1540_v8 = vmul.f32 0.0078125, %v1539_v7 }
 0x77c   : > { %v1541_v9 = vsub.f32 %v1535_v6, %v1540_v8 }
 0x77e   : > { %v1542_v10 = vmul.f32 %v1541_v9, %v1541_v9 }
 0x780   : > { %1543 = vadd.xlane.f32.xlu0 %v1542_v10 }
 0x809   : > { %v1544_v11 = vpop.xlane.xlu0 %1543 }
 0x80a   : > { %v1545_v12 = vmul.f32 0.0078125, %v1544_v11 }
 0x80c   : > { %v1546_v13 = vadd.f32 1e-05, %v1545_v12 }
 0x80e   : > { %1973 = vrsqrt.f32 %v1546_v13 }
 0x81b   : > { %v1974_v14 = vpop.eup %1973 }
 0x81c   : > { %v1548_v18 = vmul.f32 %v1974_v14, %v1541_v9 }
 0x81e   : > { %v1555_v20 = vmul.f32 %v1754_v17, %v1548_v18 }
 0x820   : > { %v1562_v21 = vadd.f32 %v1755_v19, %v1555_v20 }
 0x822   : > { %1563 = vst [vmem:[%s605_s25] sm:$0xff] %v1562_v21 }
 0x823 PF: > { %s25_s20 = sadd.s32 1, %s1997_s20   ;;  %s2365_s18 = smov %s1993_s19 }
 0x824   : > { %p22_p5 = scmp.ge.s32.totalorder %s25_s20, 4   ;;  %s2366_s19 = smov %s2368_s21 }
 0x826   :  { %24 = sbr.rel (!%p22_p5) target bundleno = 2 (0x2), region = 122 }

// kernel: encoder_forward.7
= control target key start
LH: loop header
LB: loop body
LE: loop exit
PB: predicated region body
PF: predicated region fallthrough
CT: control target
= control target key end

     0   :  { %s2505_s0 = inlined_call_operand.vmem [shape: f32[2,8,128], index: 0, kind: input, shape index: {}]   ;;  %s2506_s1 = inlined_call_operand.vmem [shape: s32[2,1,8], index: 1, kind: input, shape index: {}]   ;;  %s2507_s2 = inlined_call_operand.vmem [shape: bf16[2,4,8,32], index: 2, kind: input, shape index: {}]   ;;  %s2508_s3 = inlined_call_operand.vmem [shape: bf16[2,4,8,32], index: 3, kind: input, shape index: {}]   ;;  %s2509_s4 = inlined_call_operand.vmem [shape: bf16[2,4,8,32], index: 4, kind: input, shape index: {}]   ;;  %s2510_s5 = inlined_call_operand.vmem [shape: bf16[128,128], index: 5, kind: input, shape index: {}]   ;;  %s2511_s6 = inlined_call_operand.vmem [shape: f32[1,128], index: 6, kind: input, shape index: {}]   ;;  %s2512_s7 = inlined_call_operand.vmem [shape: f32[1,128], index: 7, kind: input, shape index: {}]   ;;  %s2513_s8 = inlined_call_operand.vmem [shape: f32[1,128], index: 8, kind: input, shape index: {}]   ;;  %s2514_s9 = inlined_call_operand.vmem [shape: bf16[128,256], index: 9, kind: input, shape index: {}]   ;;  %s2515_s10 = inlined_call_operand.vmem [shape: f32[1,256], index: 10, kind: input, shape index: {}]   ;;  %s2516_s11 = inlined_call_operand.vmem [shape: bf16[256,128], index: 11, kind: input, shape index: {}]   ;;  %s2517_s12 = inlined_call_operand.vmem [shape: f32[1,128], index: 12, kind: input, shape index: {}]   ;;  %s2518_s13 = inlined_call_operand.vmem [shape: f32[1,128], index: 13, kind: input, shape index: {}]   ;;  %s2519_s14 = inlined_call_operand.vmem [shape: f32[1,128], index: 14, kind: input, shape index: {}]   ;;  %s2520_s15 = inlined_call_operand.hbm [shape: f32[2,8,128], index: 15, kind: output, shape index: {}]  }
   0x1   :  { %2523 = sst [smem:[#allocation8_spill]] %s2505_s0 }
   0x2   :  { %2524 = sst [smem:[#allocation9_spill]] %s2506_s1 }
   0x3   :  { %2525 = sst [smem:[#allocation10_spill]] %s2507_s2 }
   0x4   :  { %2526 = sst [smem:[#allocation11_spill]] %s2508_s3 }
   0x5   :  { %2527 = sst [smem:[#allocation12_spill]] %s2509_s4 }
   0x6   :  { %2528 = sst [smem:[#allocation13_spill]] %s2510_s5 }
   0x7   :  { %20 = vsyncpa [#allocation3], 0 }
   0x8   :  { %22 = vsyncpa [#allocation3 + $0x1], 0  ;;  %s2180_s18 = smov 0   ;;  %s2182_s19 = smov 0  }
   0x9   :  { %s2184_s20 = smov 0   ;;  %s2186_s21 = smov 0  }
   0xa   :  { %s2188_s22 = smov 0   ;;  %s2190_s23 = smov 0  }
   0xb LB: > { %2529 = sst [smem:[#allocation5_spill]] %s2086_s22  ;;  %s1695_s24 = sadd.s32 4294967295, %s2090_s23   ;;  %s2090_s23 = sphi %s2190_s23, %s28_s23   ;;  %s2086_s22 = sphi %s2188_s22, %s2542_s22   ;;  %s2082_s21 = sphi %s2186_s21, %s2541_s21   ;;  %s2078_s20 = sphi %s2184_s20, %s2545_s20   ;;  %s2074_s19 = sphi %s2182_s19, %s2544_s19   ;;  %s2070_s18 = sphi %s2180_s18, %s2543_s18  }
   0xc   : > { %s1696_s25 = sadd.s32 4294967294, %s2090_s23   ;;  %s40_s26 = sadd.s32 1, %s2086_s22 }
   0xd   : > { %s393_s27 = sadd.s32 1, %s2078_s20  ;;  %p42_p0 = scmp.ge.s32.totalorder %s40_s26, 2 }
   0xe   : > { %p403_p1 = scmp.ne.s32.totalorder %s2078_s20, %s2074_s19  ;;  %p404_p2 = scmp.eq.s32.totalorder %s1695_s24, 1 }
   0xf   : > { %p409_p3 = scmp.ne.s32.totalorder %s2074_s19, %s2070_s18  ;;  %s2547_s26 = smov (%p42_p0, %s40_s26), 0 }
  0x10   : > { %2530 = sst [smem:[#allocation6_spill]] %s2547_s26  ;;  %p2220_p4 = por %p404_p2, %p403_p1 }
  0x11   : > { %p410_p5 = scmp.eq.s32.totalorder %s1696_s25, 1  ;;  %s388_s29 = ssub.s32 %s2086_s22, %s2547_s26 }
  0x12   : > { %p1699_p6 = scmp.ge.s32.totalorder %s2090_s23, 1  ;;  %p391_p7 = scmp.eq.s32.totalorder %s388_s29, 0 }
  0x13   : > { %p2227_p8 = por %p410_p5, %p409_p3  ;;  %p501_p9 = scmp.lt.s32.totalorder %s2090_s23, 3 }
  0x14   : > { %s2233_s16 = scalar_select %p391_p7, %s2078_s20, %s393_s27  }
  0x15   : > { %p502_p10 = pnand %p1699_p6, %p501_p9 }
  0x16   : > { %2533 = sst [smem:[#allocation7_spill]] %s2233_s16  ;;  %p572_p11 = scmp.lt.s32.totalorder (!%p502_p10), %s2082_s21, 1 }
  0x17   : > { %505 = sbr.rel (%p502_p10) target bundleno = 2112 (0x840), region = 80  ;;  %s2534_s3 = sld [smem:[#allocation11_spill]] (!%p502_p10) }
  0x18   : > { %s2535_s2 = sld [smem:[#allocation10_spill]] (!%p502_p10) }
  0x19   : > { %s2536_s1 = sld [smem:[#allocation9_spill]] (!%p502_p10) }
  0x1a   : > { %s2537_s4 = sld [smem:[#allocation12_spill]] (!%p502_p10) }
  0x1b   : > { %s2538_s5 = sld [smem:[#allocation13_spill]] (!%p502_p10) }
  0x1c   : > { %v2092_v0 = vmov 0.0   ;;  %vm2093_vm0 = vmmov 0   ;;  %s2240_s17 = scalar_select %p572_p11, %s2082_s21, 1  ;;  %vm623_vm1 = vcmask 261120   ;;  %v618_v13 = vlaneseq }
  0x1d   : > { %1816 = vmatprep.subr.bf16.mxu1 %v2092_v0  ;;  %1818 = vmatprep.mubr.msk.bf16.mxu1 %vm2093_vm0, %v2092_v0  ;;  %v2094_v17 = vmov -1e+10   ;;  %vm808_vm3 = vcmask 64512   ;;  %vm860_vm4 = vcmask 1043456   ;;  %vm1055_vm5 = vcmask 523264   ;;  %s2539_s0 = sld [smem:[#allocation8_spill]] }
  0x1e   : > { %1840 = vmatprep.subr.bf16.mxu0 %v2092_v0  ;;  %1842 = vmatprep.mubr.msk.bf16.mxu0 %vm2093_vm0, %v2092_v0  ;;  %s2246_s24 = sshll.u32 %s2240_s17, 4  ;;  %v2280_v15 = vshrl.u32 %v618_v13, 7  ;;  %vm1057_vm6 = vcmask 785408   ;;  %s1701_s27 = sshll.u32 %s2240_s17, 3 }
  0x1f   : > { %s594_s29 = scalar_lea.vmem %s2534_s3, %s2246_s24  ;;  %s589_s16 = scalar_lea.vmem %s2535_s2, %s2246_s24 }
  0x20   : > { %v606_v1 = vld [vmem:[%s594_s29] sm:$0xf]  ;;  %v607_v3 = vld [vmem:[%s594_s29 + $0x4] sm:$0xf]  ;;  %v608_v5 = vld [vmem:[%s594_s29 + $0x8] sm:$0xf]  ;;  %s581_s25 = scalar_lea.vmem %s2536_s1, %s2240_s17 }
  0x21   : > { %v628_v2 = vsel %vm623_vm1, %v606_v1, 0  ;;  %v602_v4 = vld [vmem:[%s589_s16] sm:$0xf]  ;;  %v674_v6 = vsel %vm623_vm1, %v607_v3, 0  ;;  %v720_v7 = vsel %vm623_vm1, %v608_v5, 0  ;;  %v620_v16 = vsub.s32 0, %v2280_v15 }
  0x22   : > { %1817 = vmatpush3.bf16.xpose.msra.mxu1 %v628_v2  ;;  %v603_v8 = vld [vmem:[%s589_s16 + $0x4] sm:$0xf]  ;;  %v609_v9 = vld [vmem:[%s594_s29 + $0xc] sm:$0xf]  ;;  %v604_v10 = vld [vmem:[%s589_s16 + $0x8] sm:$0xf]  ;;  %s599_s29 = scalar_lea.vmem %s2537_s4, %s2246_s24 }
  0x23   : > { %1822 = vmatprep.subr.bf16.mxu1 %v2092_v0  ;;  %v766_v11 = vsel %vm623_vm1, %v609_v9, 0  ;;  %v605_v12 = vld [vmem:[%s589_s16 + $0xc] sm:$0xf]  ;;  %v614_v14 = vld [vmem:[%s581_s25] sm:$0x1]  ;;  %s2095_s24 = smov 32   ;;  %s578_s22 = scalar_lea.vmem %s2539_s0, %s1701_s27 }
  0x24   : > { %vm615_vm2 = vcmp.ne.s32.totalorder %v614_v14, 0  ;;  %v610_v62 = vld [vmem:[%s599_s29] sm:$0xf]  ;;  %v611_v3 = vld [vmem:[%s599_s29 + $0x4] sm:$0xf]  ;;  %s2096_s25 = smov 64  }
  0x25   : > { %v616_v18 = vsel %vm615_vm2, 0.0, %v2094_v17  ;;  %v862_v63 = vsel %vm860_vm4, %v610_v62, 0  ;;  %v612_v5 = vld [vmem:[%s599_s29 + $0x8] sm:$0xf]  ;;  %s2097_s16 = smov 96   ;;  %s1763_s1 = sshll.u32 %s2082_s21, 7 }
  0x26   : > { %v621_v19 = vrot.slane %v616_v18, %v620_v16  ;;  %1841 = vmatpush3.bf16.msra.mxu0 %v862_v63  ;;  %s1571_s3 = scalar_lea.hbm %s2520_s15, %s1763_s1  ;;  %s2099_s27 = smov [#allocation2]  }
  0x27   : > { %1852 = vmatprep.subr.bf16.mxu0 %v2092_v0 }
  0x29   : > { %1819 = vmatmul.mubr.msk.bf16.vlgmr.msra.gmra.mxu1 %vm623_vm1, %v602_v4  ;;  %v908_v4 = vsel %vm860_vm4, %v611_v3, 0  ;;  %v1956_v3 = vld [vmem:[%s2514_s9 + $0x74] ss:$8 sps:$4 sm:$0xff]  }
  0x2a   : > { %1823 = vmatpush3.bf16.xpose.msra.mxu1 %v674_v6  ;;  %1824 = vmatprep.mubr.msk.bf16.mxu1 %vm2093_vm0, %v2092_v0  ;;  %v954_v6 = vsel %vm860_vm4, %v612_v5, 0  ;;  %v1957_v5 = vld [vmem:[%s2514_s9 + $0x60] ss:$8 sps:$4 sm:$0xff]  }
  0x2b   : > { %1828 = vmatprep.subr.bf16.mxu1 %v2092_v0 }
  0x31   : > { %1825 = vmatmul.mubr.msk.bf16.vlgmr.msra.gmra.mxu1 %vm623_vm1, %v603_v8 }
  0x32   : > { %1829 = vmatpush3.bf16.xpose.msra.mxu1 %v720_v7  ;;  %1830 = vmatprep.mubr.msk.bf16.mxu1 %vm2093_vm0, %v2092_v0  ;;  %v613_v7 = vld [vmem:[%s599_s29 + $0xc] sm:$0xf]  ;;  %s2018_s29 = sshll.u32 %s2099_s27, 4  ;;  %s2019_s29 = int_to_ptr.vmem [resolvable:$false] %s2018_s29 }
  0x33   : > { %1834 = vmatprep.subr.bf16.mxu1 %v2092_v0  ;;  %v1000_v8 = vsel %vm860_vm4, %v613_v7, 0  ;;  %s2020_s21 = scalar_lea.vmem %s2019_s29, 256 }
  0x39   : > { %1831 = vmatmul.mubr.msk.bf16.vlgmr.msra.gmra.mxu1 %vm623_vm1, %v604_v10 }
  0x3a   : > { %1835 = vmatpush3.bf16.xpose.msra.mxu1 %v766_v11  ;;  %1836 = vmatprep.mubr.msk.bf16.mxu1 %vm2093_vm0, %v2092_v0 }
  0x3b   : > { %1846 = vmatprep.subr.bf16.mxu1 %v2092_v0 }
  0x41   : > { %1837 = vmatmul.mubr.msk.bf16.vlgmr.msra.gmra.mxu1 %vm623_vm1, %v605_v12 }
  0x42   : > { %1848 = vmatprep.mubr.msk.bf16.mxu1 %vm2093_vm0, %v2092_v0  ;;  %1847 = vmatpush3.bf16.msra.mxu1 %v908_v4  ;;  %v1959_v4 = vld [vmem:[%s2514_s9 + $0x64] ss:$8 sps:$4 sm:$0xff]  }
  0x43   : > { %1858 = vmatprep.subr.bf16.mxu1 %v2092_v0 }
  0xe9   : > { %v664_v20 = vpop.f32.mrf.mxu1 }
  0xea   : > { %v665_v21 = vadd.f32 %v664_v20, %v621_v19 }
  0xeb   : > { %v1820_v22 = vpop.f32.mrf.mxu1 }
  0xec   : > { %v809_v23 = vsel %vm808_vm3, %v665_v21, -inf }
  0xed   : > { %v667_v24 = vpop.f32.mrf.mxu1  ;;  %810 = vmax.xlane.f32.xlu0 %v809_v23 }
  0xef   : > { %v1821_v25 = vpop.f32.mrf.mxu1 }
  0xf1   : > { %v710_v26 = vpop.f32.mrf.mxu1 }
  0xf2   : > { %v711_v27 = vadd.f32 %v710_v26, %v621_v19 }
  0xf3   : > { %v1826_v28 = vpop.f32.mrf.mxu1 }
  0xf4   : > { %v812_v29 = vsel %vm808_vm3, %v711_v27, -inf  ;;  %v1947_v28 = vld [vmem:[%s2538_s5 + $0x30] sm:$0xff]  }
  0xf5   : > { %v713_v30 = vpop.f32.mrf.mxu1  ;;  %813 = vmax.xlane.f32.xlu0 %v812_v29  ;;  %v1948_v29 = vld [vmem:[%s2538_s5 + $0x28] sm:$0xff]  }
  0xf6   : > { %v1949_v30 = vld [vmem:[%s2538_s5 + $0x20] sm:$0xff]  }
  0xf7   : > { %v1827_v31 = vpop.f32.mrf.mxu1 }
  0xf8   : > { %v1950_v31 = vld [vmem:[%s2538_s5 + $0x18] sm:$0xff]  }
  0xf9   : > { %v756_v32 = vpop.f32.mrf.mxu1 }
  0xfa   : > { %v757_v33 = vadd.f32 %v756_v32, %v621_v19 }
  0xfb   : > { %v1832_v34 = vpop.f32.mrf.mxu1 }
  0xfc   : > { %v815_v35 = vsel %vm808_vm3, %v757_v33, -inf  ;;  %v1951_v34 = vld [vmem:[%s2538_s5 + $0x10] sm:$0xff]  }
  0xfd   : > { %v759_v36 = vpop.f32.mrf.mxu1  ;;  %816 = vmax.xlane.f32.xlu1 %v815_v35 }
  0xfe   : > { %v1952_v36 = vld [vmem:[%s2538_s5 + $0x8] sm:$0xff]  }
  0xff   : > { %v1833_v37 = vpop.f32.mrf.mxu1 }
 0x101   : > { %v802_v38 = vpop.f32.mrf.mxu1 }
 0x102   : > { %v803_v39 = vadd.f32 %v802_v38, %v621_v19 }
 0x103   : > { %v1838_v40 = vpop.f32.mrf.mxu1 }
 0x104   : > { %v818_v41 = vsel %vm808_vm3, %v803_v39, -inf  ;;  %v1953_v40 = vld [vmem:[%s2538_s5] sm:$0xff]  }
 0x105   : > { %v805_v42 = vpop.f32.mrf.mxu1  ;;  %819 = vmax.xlane.f32.xlu1 %v818_v41 }
 0x107   : > { %v1839_v43 = vpop.f32.mrf.mxu1 }
 0x176   : > { %v811_v44 = vpop.xlane.xlu0 %810 }
 0x177   : > { %v821_v45 = vsub.f32 %v665_v21, %v811_v44 }
 0x179   : > { %v825_v46 = vmul.f32 1.442695, %v821_v45 }
 0x17b   : > { %1994 = vpow2.f32 %v825_v46 }
 0x17e   : > { %v814_v47 = vpop.xlane.xlu0 %813 }
 0x17f   : > { %v822_v48 = vsub.f32 %v711_v27, %v814_v47  ;;  %v1946_v27 = vld [vmem:[%s2538_s5 + $0x38] sm:$0xff]  }
 0x181   : > { %v827_v49 = vmul.f32 1.442695, %v822_v48 }
 0x183   : > { %1996 = vpow2.f32 %v827_v49 }
 0x186   : > { %v817_v50 = vpop.xlane.xlu1 %816 }
 0x187   : > { %v823_v51 = vsub.f32 %v757_v33, %v817_v50 }
 0x188   : > { %v1995_v52 = vpop.eup %1994 }
 0x189   : > { %v829_v53 = vmul.f32 1.442695, %v823_v51  ;;  %v833_v54 = vsel %vm808_vm3, %v1995_v52, 0.0 }
 0x18a   : > { %834 = vadd.xlane.f32.xlu0 %v833_v54 }
 0x18b   : > { %1998 = vpow2.f32 %v829_v53 }
 0x18e   : > { %v820_v55 = vpop.xlane.xlu1 %819 }
 0x18f   : > { %v824_v56 = vsub.f32 %v803_v39, %v820_v55 }
 0x190   : > { %v1997_v57 = vpop.eup %1996 }
 0x191   : > { %v831_v58 = vmul.f32 1.442695, %v824_v56  ;;  %v836_v59 = vsel %vm808_vm3, %v1997_v57, 0.0 }
 0x192   : > { %837 = vadd.xlane.f32.xlu1 %v836_v59  ;;  %v601_v59 = vld [vmem:[%s578_s22] sm:$0xff] }
 0x193   : > { %2000 = vpow2.f32 %v831_v58 }
 0x198   : > { %v1999_v60 = vpop.eup %1998 }
 0x199   : > { %v839_v61 = vsel %vm808_vm3, %v1999_v60, 0.0 }
 0x19a   : > { %840 = vadd.xlane.f32.xlu0 %v839_v61 }
 0x1a0   : > { %v2001_v1 = vpop.eup %2000 }
 0x1a1   : > { %v842_v2 = vsel %vm808_vm3, %v2001_v1, 0.0 }
 0x1a2   : > { %843 = vadd.xlane.f32.xlu1 %v842_v2  ;;  %v1954_v2 = vld [vmem:[%s2514_s9 + $0x70] ss:$8 sps:$4 sm:$0xff]  }
 0x213   : > { %v835_v9 = vpop.xlane.xlu0 %834 }
 0x214   : > { %2002 = vrcp.f32 %v835_v9 }
 0x21b   : > { %v838_v10 = vpop.xlane.xlu1 %837 }
 0x21c   : > { %2004 = vrcp.f32 %v838_v10  ;;  %v1962_v10 = vld [vmem:[%s2514_s9 + $0x54] ss:$8 sps:$4 sm:$0xff]  }
 0x221   : > { %v2003_v11 = vpop.eup %2002 }
 0x222   : > { %v849_v12 = vmul.f32 %v2003_v11, %v1995_v52  ;;  %v1960_v11 = vld [vmem:[%s2514_s9 + $0x50] ss:$8 sps:$4 sm:$0xff]  }
 0x223   : > { %v841_v13 = vpop.xlane.xlu0 %840 }
 0x224   : > { %2006 = vrcp.f32 %v841_v13  ;;  %v853_v14 = vpack.c.bf16 %v849_v12, %v849_v12  ;;  %v1963_v12 = vld [vmem:[%s2514_s9 + $0x40] ss:$8 sps:$4 sm:$0xff]   ;;  %v1965_v13 = vld [vmem:[%s2514_s9 + $0x44] ss:$8 sps:$4 sm:$0xff]  }
 0x226   : > { %1843 = vmatmul.mubr.msk.bf16.vlgmr.msra.gmra.mxu0 %vm808_vm3, %v853_v14  ;;  %v1968_v14 = vld [vmem:[%s2514_s9 + $0x34] ss:$8 sps:$4 sm:$0xff]  }
 0x227   : > { %1853 = vmatpush3.bf16.msra.mxu0 %v954_v6  ;;  %1854 = vmatprep.mubr.msk.bf16.mxu0 %vm2093_vm0, %v2092_v0 }
 0x228   : > { %1864 = vmatprep.subr.bf16.mxu0 %v2092_v0 }
 0x229   : > { %v2005_v17 = vpop.eup %2004 }
 0x22a   : > { %v850_v18 = vmul.f32 %v2005_v17, %v1997_v57  ;;  %v1716_v57 = vld [vmem:[%s2511_s6] ss:$0 sm:$0xff]  ;;  %v1966_v17 = vld [vmem:[%s2514_s9 + $0x30] ss:$8 sps:$4 sm:$0xff]  }
 0x22b   : > { %v844_v19 = vpop.xlane.xlu1 %843 }
 0x22c   : > { %2008 = vrcp.f32 %v844_v19  ;;  %v854_v20 = vpack.c.bf16 %v850_v18, %v850_v18  ;;  %v1971_v18 = vld [vmem:[%s2514_s9 + $0x24] ss:$8 sps:$4 sm:$0xff]   ;;  %v2098_v19 = vmov 0  }
 0x22e   : > { %1849 = vmatmul.mubr.msk.bf16.vlgmr.msra.gmra.mxu1 %vm808_vm3, %v854_v20  ;;  %v1969_v20 = vld [vmem:[%s2514_s9 + $0x20] ss:$8 sps:$4 sm:$0xff]  }
 0x22f   : > { %1859 = vmatpush3.bf16.msra.mxu1 %v1000_v8  ;;  %1860 = vmatprep.mubr.msk.bf16.mxu1 %vm2093_vm0, %v2092_v0 }
 0x230   : > { %1309 = vmatprep.subr.bf16.mxu1 %v1956_v3 }
 0x231   : > { %v2007_v21 = vpop.eup %2006 }
 0x232   : > { %v851_v22 = vmul.f32 %v2007_v21, %v1999_v60  ;;  %v1974_v21 = vld [vmem:[%s2514_s9 + $0x14] ss:$8 sps:$4 sm:$0xff]  }
 0x234   : > { %v855_v23 = vpack.c.bf16 %v851_v22, %v851_v22  ;;  %v1972_v22 = vld [vmem:[%s2514_s9 + $0x10] ss:$8 sps:$4 sm:$0xff]  }
 0x236   : > { %1855 = vmatmul.mubr.msk.bf16.vlgmr.msra.gmra.mxu0 %vm808_vm3, %v855_v23  ;;  %v1977_v23 = vld [vmem:[%s2514_s9 + $0x4] ss:$8 sps:$4 sm:$0xff]  }
 0x237   : > { %1880 = vmatprep.mubr.msk.bf16.mxu0 %vm2093_vm0, %v2092_v0  ;;  %1865 = vmatpush3.bf16.msra.mxu0 %v1946_v27  ;;  %v1980_v27 = vld [vmem:[%s2516_s11 + $0x70] sm:$0xff]  }
 0x238   : > { %1866 = vmatprep.subr.bf16.mxu0 %v2092_v0 }
 0x239   : > { %v2009_v24 = vpop.eup %2008 }
 0x23a   : > { %v852_v25 = vmul.f32 %v2009_v24, %v2001_v1  ;;  %v1975_v24 = vld [vmem:[%s2514_s9] ss:$8 sps:$4 sm:$0xff]  }
 0x23b   : > { %1867 = vmatpush3.bf16.msra.mxu0 %v1947_v28  ;;  %v1981_v28 = vld [vmem:[%s2516_s11 + $0x30] sm:$0xff]  }
 0x23c   : > { %v856_v26 = vpack.c.bf16 %v852_v25, %v852_v25  ;;  %1868 = vmatprep.subr.bf16.mxu0 %v2092_v0  ;;  %v1978_v25 = vld [vmem:[%s2516_s11 + $0x78] sm:$0xff]  }
 0x23e   : > { %1861 = vmatmul.mubr.msk.bf16.vlgmr.msra.gmra.mxu1 %vm808_vm3, %v856_v26  ;;  %v1979_v26 = vld [vmem:[%s2516_s11 + $0x38] sm:$0xff]  }
 0x23f   : > { %1869 = vmatpush3.bf16.msra.mxu0 %v1948_v29  ;;  %1310 = vmatpush1.bf16.msra.mxu1 %v1954_v2  ;;  %v1982_v29 = vld [vmem:[%s2516_s11 + $0x68] sm:$0xff]   ;;  %v1743_v2 = vld [vmem:[%s2517_s12] ss:$0 sm:$0xff] }
 0x240   : > { %1870 = vmatprep.subr.bf16.mxu0 %v2092_v0  ;;  %1311 = vmatprep.subr.bf16.mxu1 %v1959_v4 }
 0x241   : > { %1341 = vmatprep.mubr.bf16.mxu1 %v2098_v19  ;;  %v1761_v19 = vld [vmem:[%s2519_s14] ss:$0 sm:$0xff] }
 0x243   : > { %1871 = vmatpush3.bf16.msra.mxu0 %v1949_v30  ;;  %1312 = vmatpush1.bf16.msra.mxu1 %v1957_v5  ;;  %v1983_v30 = vld [vmem:[%s2516_s11 + $0x28] sm:$0xff]  }
 0x244   : > { %1872 = vmatprep.subr.bf16.mxu0 %v2092_v0  ;;  %1313 = vmatprep.subr.bf16.mxu1 %v1962_v10 }
 0x247   : > { %1873 = vmatpush3.bf16.msra.mxu0 %v1950_v31  ;;  %1314 = vmatpush1.bf16.msra.mxu1 %v1960_v11  ;;  %v1984_v31 = vld [vmem:[%s2516_s11 + $0x60] sm:$0xff]  }
 0x248   : > { %1874 = vmatprep.subr.bf16.mxu0 %v2092_v0  ;;  %1315 = vmatprep.subr.bf16.mxu1 %v1965_v13 }
 0x24b   : > { %1875 = vmatpush3.bf16.msra.mxu0 %v1951_v34  ;;  %1316 = vmatpush1.bf16.msra.mxu1 %v1963_v12  ;;  %v1987_v34 = vld [vmem:[%s2516_s11 + $0x18] sm:$0xff]  }
 0x24c   : > { %1876 = vmatprep.subr.bf16.mxu0 %v2092_v0  ;;  %1317 = vmatprep.subr.bf16.mxu1 %v1968_v14 }
 0x24f   : > { %1877 = vmatpush3.bf16.msra.mxu0 %v1952_v36  ;;  %1318 = vmatpush1.bf16.msra.mxu1 %v1966_v17  ;;  %v1989_v36 = vld [vmem:[%s2516_s11 + $0x10] sm:$0xff]   ;;  %v1760_v17 = vld [vmem:[%s2518_s13] ss:$0 sm:$0xff] }
 0x250   : > { %1878 = vmatprep.subr.bf16.mxu0 %v2092_v0  ;;  %1319 = vmatprep.subr.bf16.mxu1 %v1971_v18 }
 0x253   : > { %1879 = vmatpush3.bf16.msra.mxu0 %v1953_v40  ;;  %1320 = vmatpush1.bf16.msra.mxu1 %v1969_v20 }
 0x254   : > { %1321 = vmatprep.subr.bf16.mxu1 %v1974_v21  ;;  %1794 = vmatprep.subr.bf16.mxu0 %v1978_v25 }
 0x257   : > { %1322 = vmatpush1.bf16.msra.mxu1 %v1972_v22 }
 0x258   : > { %1323 = vmatprep.subr.bf16.mxu1 %v1977_v23 }
 0x25b   : > { %1324 = vmatpush1.bf16.msra.mxu1 %v1975_v24 }
 0x2e6   : > { %v898_v32 = vpop.f32.mrf.mxu0 }
 0x2e8   : > { %v1844_v33 = vpop.f32.mrf.mxu0 }
 0x2e9   : > { %v1986_v33 = vld [vmem:[%s2516_s11 + $0x58] sm:$0xff]  }
 0x2ea   : > { %v901_v35 = vpop.f32.mrf.mxu0 }
 0x2eb   : > { %v1988_v35 = vld [vmem:[%s2516_s11 + $0x50] sm:$0xff]  }
 0x2ec   : > { %v1845_v37 = vpop.f32.mrf.mxu0 }
 0x2ee   : > { %v944_v38 = vpop.f32.mrf.mxu1 }
 0x2ef   : > { %1043 = vrot.lane.b32.xlu0 %v944_v38, %s2095_s24 }
 0x2f0   : > { %v1850_v39 = vpop.f32.mrf.mxu1 }
 0x2f2   : > { %v947_v41 = vpop.f32.mrf.mxu1 }
 0x2f3   : > { %v1725_v41 = vld [vmem:[%s2512_s7] ss:$0 sm:$0xff] }
 0x2f4   : > { %v1851_v42 = vpop.f32.mrf.mxu1 }
 0x2f6   : > { %v990_v43 = vpop.f32.mrf.mxu0 }
 0x2f7   : > { %1047 = vrot.lane.b32.xlu1 %v990_v43, %s2096_s25  ;;  %v1726_v43 = vld [vmem:[%s2513_s8] ss:$0 sm:$0xff] }
 0x2f8   : > { %v1856_v44 = vpop.f32.mrf.mxu0 }
 0x2fa   : > { %v993_v45 = vpop.f32.mrf.mxu0 }
 0x2fc   : > { %v1857_v46 = vpop.f32.mrf.mxu0 }
 0x2fe   : > { %v1036_v47 = vpop.f32.mrf.mxu1 }
 0x2ff   : > { %1051 = vrot.lane.b32.xlu1 %v1036_v47, %s2097_s16  ;;  %v1990_v47 = vld [vmem:[%s2516_s11 + $0x48] sm:$0xff]   ;;  %s569_s16 = sand.u32 1, %s2074_s19  }
 0x300   : > { %v1862_v48 = vpop.f32.mrf.mxu1  ;;  %s1700_s17 = sshll.u32 %s569_s16, 3  ;;  %s1559_s4 = scalar_lea.sflag [#allocation3], %s569_s16 }
 0x301   : > { %v1991_v48 = vld [vmem:[%s2516_s11 + $0x8] sm:$0xff]   ;;  %s571_s2 = scalar_lea.vmem [#allocation2], %s1700_s17 }
 0x302   : > { %v1039_v0 = vpop.f32.mrf.mxu1  ;;  %s1573_s26 = sshll.u32 %s571_s2, 4  ;;  %s1574_s26 = int_to_ptr.vmem [resolvable:$true] %s1573_s26 }
 0x303   : > { %v1992_v0 = vld [vmem:[%s2516_s11 + $0x40] sm:$0xff]   ;;  %s2014_s5 = scalar_lea.vmem %s1574_s26, 128  ;;  %p2021_p1 = scmp.lt.s32.totalorder %s1574_s26, %s2019_s29 }
 0x304   : > { %v1863_v49 = vpop.f32.mrf.mxu1  ;;  %p2015_p12 = scmp.ne.s32.totalorder %s1574_s26, %s2014_s5  ;;  %p2022_p2 = scmp.lt.s32.totalorder %s2020_s21, %s2014_s5 }
 0x305   : > { %v1993_v49 = vld [vmem:[%s2516_s11] sm:$0xff]  }
 0x306   : > { %p2016_p13 = pnand %p2015_p12, %p2220_p4  ;;  %p2023_p3 = por %p2022_p2, %p2021_p1 }
 0x308   : > { %p2017_p0 = pneg %p2016_p13 }
 0x30a   : > { %p2024_p5 = pnand %p2023_p3, %p2017_p0 }
 0x361   : > { %v1044_v50 = vpop.permute.xlu0 %1043 }
 0x362   : > { %v1054_v52 = vsel %vm623_vm1, %v898_v32, %v1044_v50  ;;  %v1985_v32 = vld [vmem:[%s2516_s11 + $0x20] sm:$0xff]  }
 0x363   : > { %v1217_v50 = vld [vmem:[%s2515_s10] sm:$0x3] }
 0x369   : > { %v1048_v51 = vpop.permute.xlu1 %1047 }
 0x36a   : > { %v1056_v53 = vsel %vm1055_vm5, %v1054_v52, %v1048_v51  ;;  %v1225_v51 = vsub.s32 1, %v2280_v15  ;;  %v1222_v52 = vrot.slane %v1217_v50, %v620_v16 }
 0x371   : > { %v1052_v54 = vpop.permute.xlu1 %1051 }
 0x372   : > { %v1058_v55 = vsel %vm1057_vm6, %v1056_v53, %v1052_v54  ;;  %v1226_v53 = vrot.slane %v1217_v50, %v1225_v51 }
 0x373   : > { %v1059_v56 = vpack.c.bf16 %v1058_v55, %v1058_v55 }
 0x375   : > { %1881 = vmatmul.mubr.bf16.vlgmr.msra.gmra.mxu0 %v1059_v56 }
 0x376   : > { %1795 = vmatpush3.bf16.msra.mxu0 %v1979_v26 }
 0x377   : > { %1796 = vmatprep.subr.bf16.mxu0 %v1980_v27 }
 0x37a   : > { %1797 = vmatpush3.bf16.msra.mxu0 %v1981_v28 }
 0x37b   : > { %1798 = vmatprep.subr.bf16.mxu0 %v1982_v29 }
 0x37e   : > { %1799 = vmatpush3.bf16.msra.mxu0 %v1983_v30 }
 0x37f   : > { %1800 = vmatprep.subr.bf16.mxu0 %v1984_v31 }
 0x382   : > { %1801 = vmatpush3.bf16.msra.mxu0 %v1985_v32 }
 0x383   : > { %1802 = vmatprep.subr.bf16.mxu0 %v1986_v33 }
 0x386   : > { %1803 = vmatpush3.bf16.msra.mxu0 %v1987_v34 }
 0x387   : > { %1804 = vmatprep.subr.bf16.mxu0 %v1988_v35 }
 0x38a   : > { %1805 = vmatpush3.bf16.msra.mxu0 %v1989_v36 }
 0x38b   : > { %1806 = vmatprep.subr.bf16.mxu0 %v1990_v47 }
 0x38e   : > { %1807 = vmatpush3.bf16.msra.mxu0 %v1991_v48 }
 0x38f   : > { %1808 = vmatprep.subr.bf16.mxu0 %v1992_v0 }
 0x392   : > { %1809 = vmatpush3.bf16.msra.mxu0 %v1993_v49 }
 0x435   : > { %v1165_v58 = vpop.f32.mrf.mxu0 }
 0x436   : > { %v1166_v60 = vadd.f32 %v1716_v57, %v1165_v58 }
 0x437   : > { %v1882_v61 = vpop.f32.mrf.mxu0 }
 0x438   : > { %v1171_v62 = vadd.f32 %v1166_v60, %v601_v59 }
 0x439   : > { %v1168_v63 = vpop.f32.mrf.mxu0 }
 0x43a   : > { %1174 = vadd.xlane.f32.xlu1 %v1171_v62 }
 0x43b   : > { %v1883_v1 = vpop.f32.mrf.mxu0 }
 0x4c3   : > { %v1175_v6 = vpop.xlane.xlu1 %1174 }
 0x4c4   : > { %v1177_v7 = vmul.f32 0.0078125, %v1175_v6 }
 0x4c6   : > { %v1178_v8 = vsub.f32 %v1171_v62, %v1177_v7 }
 0x4c8   : > { %v1179_v9 = vmul.f32 %v1178_v8, %v1178_v8 }
 0x4ca   : > { %1180 = vadd.xlane.f32.xlu0 %v1179_v9 }
 0x553   : > { %v1181_v37 = vpop.xlane.xlu0 %1180 }
 0x554   : > { %v1182_v38 = vmul.f32 0.0078125, %v1181_v37 }
 0x556   : > { %v1183_v39 = vadd.f32 1e-05, %v1182_v38 }
 0x558   : > { %2010 = vrsqrt.f32 %v1183_v39 }
 0x565   : > { %v2011_v40 = vpop.eup %2010 }
 0x566   : > { %v1185_v42 = vmul.f32 %v2011_v40, %v1178_v8 }
 0x568   : > { %v1192_v44 = vmul.f32 %v1725_v41, %v1185_v42 }
 0x56a   : > { %v1199_v45 = vadd.f32 %v1726_v43, %v1192_v44 }
 0x56c   : > { %v1200_v46 = vpack.c.bf16 %v1199_v45, %v1199_v45 }
 0x56e   : > { %1342 = vmatmul.mubr.bf16.vlgmr.msra.gmra.mxu1 %v1200_v46 }
 0x62e   : > { %v1343_v54 = vpop.f32.mrf.mxu1 }
 0x62f   : > { %v1344_v55 = vadd.f32 %v1343_v54, %v1222_v52 }
 0x630   : > { %v1345_v56 = vpop.f32.mrf.mxu1 }
 0x631   : > { %v1346_v57 = vadd.f32 %v1345_v56, %v1226_v53  ;;  %v1350_v58 = vmax.f32 %v1344_v55, 0.0 }
 0x632   : > { %v1347_v59 = vpop.f32.mrf.mxu1 }
 0x633   : > { %v1351_v60 = vmax.f32 %v1346_v57, 0.0  ;;  %v1352_v63 = vpack.c.bf16 %v1350_v58, %v1350_v58 }
 0x634   : > { %v1348_v61 = vpop.f32.mrf.mxu1 }
 0x635   : > { %v1353_v62 = vpack.c.bf16 %v1351_v60, %v1351_v60 }
 0x637   : > { %1521 = vmatprep.mubr.bf16.mxu0 %v1353_v62 }
 0x638   : > { %1522 = vmatmul.mubr.bf16.vlgmr.msra.gmra.mxu0 %v1352_v63 }
 0x6f8   : > { %v1810_v1 = vpop.f32.mrf.mxu0 }
 0x6fa   : > { %v1811_v15 = vpop.f32.mrf.mxu0 }
 0x6fb   : > { %v1812_v16 = vadd.f32 %v1811_v15, %v1810_v1 }
 0x6fc   : > { %v1813_v3 = vpop.f32.mrf.mxu0 }
 0x6fd   : > { %v1524_v4 = vadd.f32 %v1812_v16, %v1743_v2 }
 0x6fe   : > { %v1814_v5 = vpop.f32.mrf.mxu0 }
 0x6ff   : > { %v1529_v6 = vadd.f32 %v1524_v4, %v1199_v45 }
 0x701   : > { %1532 = vadd.xlane.f32.xlu0 %v1529_v6 }
 0x78a   : > { %v1533_v7 = vpop.xlane.xlu0 %1532 }
 0x78b   : > { %v1534_v8 = vmul.f32 0.0078125, %v1533_v7 }
 0x78d   : > { %v1535_v9 = vsub.f32 %v1529_v6, %v1534_v8 }
 0x78f   : > { %v1536_v10 = vmul.f32 %v1535_v9, %v1535_v9 }
 0x791   : > { %1537 = vadd.xlane.f32.xlu0 %v1536_v10 }
 0x81a   : > { %v1538_v11 = vpop.xlane.xlu0 %1537 }
 0x81b   : > { %v1539_v12 = vmul.f32 0.0078125, %v1538_v11 }
 0x81d   : > { %v1540_v13 = vadd.f32 1e-05, %v1539_v12 }
 0x81f   : > { %2012 = vrsqrt.f32 %v1540_v13 }
 0x82c   : > { %v2013_v14 = vpop.eup %2012 }
 0x82d   : > { %v1542_v18 = vmul.f32 %v2013_v14, %v1535_v9 }
 0x82f   : > { %v1549_v20 = vmul.f32 %v1760_v17, %v1542_v18 }
 0x831   : > { %v1556_v21 = vadd.f32 %v1761_v19, %v1549_v20 }
 0x833   : > { %1557 = vst [vmem:[%s571_s2] sm:$0xff] %v1556_v21 }
 0x834   : > { %2027 = shalt.err (!%p2024_p5)
}
 0x835   : > { %s2028_s17 = scalar_lea.hbm %s1571_s3, 128  ;;  %s2032_s24 = scalar_lea.hbm %s2520_s15, 256 }
 0x836   : > { %p2029_p6 = scmp.ne.s32.totalorder %s1571_s3, %s2028_s17  ;;  %p2033_p10 = scmp.lt.s32.totalorder %s1571_s3, %s2520_s15 }
 0x837   : > { %p2034_p11 = scmp.lt.s32.totalorder %s2032_s24, %s2028_s17 }
 0x838   : > { %p2030_p7 = pnand %p2029_p6, %p2220_p4 }
 0x839   : > { %p2035_p12 = por %p2034_p11, %p2033_p10 }
 0x83a   : > { %p2031_p9 = pneg %p2030_p7 }
 0x83c   : > { %p2036_p13 = pnand %p2035_p12, %p2031_p9 }
 0x83e   : > { %2039 = shalt.err (!%p2036_p13)
}
 0x83f   : > { %1884 = dma.vmem_to_hbm [thread:$0]  (%p2220_p4), %s1574_s26, 128, %s1571_s3, %s1559_s4  }
 0x840 PF: > { %p1890_p0 = scmp.ge.s32.totalorder %s2090_s23, 2  ;;  %s1585_s5 = sand.u32 1, %s2070_s18  }
 0x841   : > { %s1586_s2 = scalar_lea.sflag [#allocation3], %s1585_s5 }
 0x842   : > { %p1887_p1 = pnand %p1890_p0, %p2227_p8 }
 0x844   : > { %p1888_p2 = pneg %p1887_p1 }
 0x846   : > { %2065 = dma.done.wait (%p1888_p2), %s1586_s2, 128  }
 0x847   : > { %2067 = vsyncadd (%p1888_p2), %s1586_s2, 4294967168  ;;  %s28_s23 = sadd.s32 1, %s2090_s23   ;;  %s2540_s25 = sld [smem:[#allocation7_spill]] }
 0x848   : > { %p25_p3 = scmp.ge.s32.totalorder %s28_s23, 4   ;;  %s2541_s21 = sld [smem:[#allocation5_spill]] }
 0x849   : > { %s2542_s22 = sld [smem:[#allocation6_spill]]  ;;  %s2543_s18 = smov %s2074_s19 }
 0x84a   : > { %s2544_s19 = smov %s2078_s20  ;;  %27 = sbr.rel (!%p25_p3) target bundleno = 11 (0xb), region = 127 }
 0x84d   : > { %s2545_s20 = smov %s2540_s25 }
 0x84f   :  { %1591 = vsyncpa [#allocation3], 1 }
 0x850   :  { %1593 = vsyncpa [#allocation3 + $0x1], 1 }

</bundles_post_ra>
